<compile_context>
chip_gen: v7x
topology: tpu7x:2x2x1
jax: 0.10.0
libtpu: 0.0.40
codegen_flags: <defaults>
</compile_context>

<pallas_src>
import functools

import jax
import jax.numpy as jnp
from jax.experimental import pallas as pl
from jax.experimental.pallas import tpu as pltpu

VMEM_LIMIT = 32 * 1024 * 1024   # fits the scoped-VMEM budget on v5e/v6e/v7x


# ----------------------------------------------------------------------------
# Small helpers
# ----------------------------------------------------------------------------
def _pad128(c):
    return ((c + 127) // 128) * 128


def _pick_tile(total, target):
    """Largest divisor of `total` <= target that is a multiple of 8 (or total)."""
    target = max(1, min(total, target))
    for t in range(target, 0, -1):
        if total % t == 0 and (t % 8 == 0 or t == total):
            return t
    return total


def _pick_div(total, target):
    """Largest divisor of `total` that is <= target."""
    target = max(1, min(total, target))
    for t in range(target, 0, -1):
        if total % t == 0:
            return t
    return total


# ----------------------------------------------------------------------------
# Pallas kernels
# ----------------------------------------------------------------------------
def _mm_bn_relu_kernel(x_ref, w_ref, b_ref, o_ref):
    """1x1 conv + folded BN + ReLU: one bf16 MXU matmul per row tile."""
    y = jnp.dot(x_ref[...], w_ref[...], preferred_element_type=jnp.float32)
    o_ref[...] = jnp.maximum(y + b_ref[...], 0.0).astype(o_ref.dtype)


def _conv1d_bn_relu_kernel(x_ref, w_ref, b_ref, o_ref, acc_ref, *, L, T):
    """T-tap conv along the padded L axis + folded BN + ReLU.

    x_ref: (tr, L + T - 1, Cin) bf16 block; w_ref: (T, Cin, Cout) VMEM-resident.
    Taps are shifted static slices of the resident block (no HBM duplication).
    """
    C = x_ref.shape[2]
    acc_ref[...] = jnp.zeros_like(acc_ref)
    for t in range(T):                              # static tap loop
        xt = x_ref[:, t:t + L, :].reshape(-1, C)
        acc_ref[...] += jnp.dot(xt, w_ref[t],
                                preferred_element_type=jnp.float32)
    y = jnp.maximum(acc_ref[...] + b_ref[...], 0.0)
    o_ref[...] = y.reshape(o_ref.shape).astype(o_ref.dtype)


def _avgpool_conv_kernel(x_ref, rc_ref, w_ref, b_ref, o_ref, acc_ref, *, H, W):
    """Fused 3x3 avg-pool (count_include_pad=False) + 1x1 conv + BN + ReLU."""
    C = x_ref.shape[3]
    acc_ref[...] = jnp.zeros_like(acc_ref)
    for dh in range(3):
        for dw in range(3):
            tap = x_ref[:, dh:dh + H, dw:dw + W, :].astype(jnp.float32)
            acc_ref[...] += tap.reshape(H * W, C)
    pooled = (acc_ref[...] * rc_ref[...]).astype(jnp.bfloat16)
    y = jnp.dot(pooled, w_ref[...], preferred_element_type=jnp.float32)
    y = jnp.maximum(y + b_ref[...], 0.0)
    o_ref[...] = y.reshape(o_ref.shape).astype(o_ref.dtype)


# ----------------------------------------------------------------------------
# Wrappers
# ----------------------------------------------------------------------------
def conv1x1_bn_relu(x_rows, w, b, out_dtype):
    """x_rows: [M, Cin] bf16; w: [Cin, Cout] bf16; b: [Cout] f32."""
    M, Cin = x_rows.shape
    Cout = w.shape[1]
    tm = _pick_tile(M, min(512, max(8, M // 2)))      # >=2 tiles when possible
    return pl.pallas_call(
        _mm_bn_relu_kernel,
        out_shape=jax.ShapeDtypeStruct((M, Cout), out_dtype),
        grid_spec=pltpu.PrefetchScalarGridSpec(
            num_scalar_prefetch=0,
            grid=(M // tm,),
            in_specs=[
                pl.BlockSpec((tm, Cin), lambda m: (m, 0)),
                pl.BlockSpec((Cin, Cout), lambda m: (0, 0)),   # VMEM-resident
                pl.BlockSpec((1, Cout), lambda m: (0, 0)),
            ],
            out_specs=pl.BlockSpec((tm, Cout), lambda m: (m, 0)),
        ),
        compiler_params=pltpu.CompilerParams(
            dimension_semantics=("parallel",),
            vmem_limit_bytes=VMEM_LIMIT),
    )(x_rows, w, b.reshape(1, Cout))


def conv1d_bn_relu(x_nhwc, w_taps, b, axis, out_dtype):
    """Stride-1 conv along one spatial axis (1x7 -> axis=2, 7x1 -> axis=1)."""
    x = jnp.swapaxes(x_nhwc, 1, 2) if axis == 1 else x_nhwc   # conv axis last
    N, A, L, C = x.shape
    T, _, Cout = w_taps.shape
    pad = (T - 1) // 2
    xp = jnp.pad(x, ((0, 0), (0, 0), (pad, pad), (0, 0)))      # [N, A, Lp, C]
    Lp = L + 2 * pad
    R = N * A
    xr = xp.reshape(R, Lp, C)
    tr = _pick_div(R, min(max(1, 512 // L), max(1, R // 2)))
    kern = functools.partial(_conv1d_bn_relu_kernel, L=L, T=T)
    out = pl.pallas_call(
        kern,
        out_shape=jax.ShapeDtypeStruct((R, L, Cout), out_dtype),
        grid_spec=pltpu.PrefetchScalarGridSpec(
            num_scalar_prefetch=0,
            grid=(R // tr,),
            in_specs=[
                pl.BlockSpec((tr, Lp, C), lambda r: (r, 0, 0)),
                pl.BlockSpec((T, C, Cout), lambda r: (0, 0, 0)),  # resident
                pl.BlockSpec((1, Cout), lambda r: (0, 0)),
            ],
            out_specs=pl.BlockSpec((tr, L, Cout), lambda r: (r, 0, 0)),
            scratch_shapes=[pltpu.VMEM((tr * L, Cout), jnp.float32)],
        ),
        compiler_params=pltpu.CompilerParams(
            dimension_semantics=("parallel",),
            vmem_limit_bytes=VMEM_LIMIT),
    )(xr, w_taps, b.reshape(1, Cout))
    out = out.reshape(N, A, L, Cout)
    return jnp.swapaxes(out, 1, 2) if axis == 1 else out


def avgpool_conv_bn_relu(x_nhwc, w, b, out_dtype):
    """Fused AvgPool2d(3, s=1, p=1, count_include_pad=False) + 1x1 conv."""
    N, H, W, C = x_nhwc.shape
    Cout = w.shape[1]
    xp = jnp.pad(x_nhwc, ((0, 0), (1, 1), (1, 1), (0, 0)))
    ih, iw = jnp.arange(H), jnp.arange(W)
    ch = 1.0 + (ih > 0).astype(jnp.float32) + (ih < H - 1).astype(jnp.float32)
    cw = 1.0 + (iw > 0).astype(jnp.float32) + (iw < W - 1).astype(jnp.float32)
    rcnt = (1.0 / (ch[:, None] * cw[None, :])).reshape(H * W, 1)
    kern = functools.partial(_avgpool_conv_kernel, H=H, W=W)
    return pl.pallas_call(
        kern,
        out_shape=jax.ShapeDtypeStruct((N, H, W, Cout), out_dtype),
        grid_spec=pltpu.PrefetchScalarGridSpec(
            num_scalar_prefetch=0,
            grid=(N,),
            in_specs=[
                pl.BlockSpec((1, H + 2, W + 2, C), lambda n: (n, 0, 0, 0)),
                pl.BlockSpec((H * W, 1), lambda n: (0, 0)),
                pl.BlockSpec((C, Cout), lambda n: (0, 0)),        # resident
                pl.BlockSpec((1, Cout), lambda n: (0, 0)),
            ],
            out_specs=pl.BlockSpec((1, H, W, Cout), lambda n: (n, 0, 0, 0)),
            scratch_shapes=[pltpu.VMEM((H * W, C), jnp.float32)],
        ),
        compiler_params=pltpu.CompilerParams(
            dimension_semantics=("parallel",),
            vmem_limit_bytes=VMEM_LIMIT),
    )(xp, rcnt, w, b.reshape(1, Cout))


# ----------------------------------------------------------------------------
# Deterministic parameter construction (BasicConv2d = conv(no bias)+BN+ReLU)
# ----------------------------------------------------------------------------
def init_basic_conv(key, cin, cout, kh, kw, ph, pw):
    kw_, kg, kb, km, kv = jax.random.split(key, 5)
    w = jax.random.normal(kw_, (cout, cin, kh, kw), jnp.float32)
    w = w / jnp.sqrt(float(cin * kh * kw))
    gamma = 1.0 + 0.1 * jax.random.normal(kg, (cout,), jnp.float32)
    beta = 0.1 * jax.random.normal(kb, (cout,), jnp.float32)
    rmean = 0.1 * jax.random.normal(km, (cout,), jnp.float32)
    rvar = 1.0 + jax.random.uniform(kv, (cout,), jnp.float32)
    eps = 0.001
    scale = gamma / jnp.sqrt(rvar + eps)                   # [cout]
    # [cout,cin,kh,kw] -> [kh,kw,cin,cout] -> [T,cin,cout], fold BN scale.
    w_taps = jnp.transpose(w, (2, 3, 1, 0)).reshape(kh * kw, cin, cout) * scale
    bias = beta - rmean * scale
    # Lane-dense padded + bf16 copies for the Pallas path.
    cin_p, cout_p = _pad128(cin), _pad128(cout)
    w_pal = jnp.zeros((kh * kw, cin_p, cout_p), jnp.float32)
    w_pal = w_pal.at[:, :cin, :cout].set(w_taps).astype(jnp.bfloat16)
    b_pal = jnp.zeros((cout_p,), jnp.float32).at[:cout].set(bias)
    return dict(w=w_pal, b=b_pal, w_ref=w_taps, b_ref=bias,
                kh=kh, kw=kw, ph=ph, pw=pw,
                cin=cin, cout=cout, cin_p=cin_p, cout_p=cout_p)


def make_inception_b_params(key):
    ks = jax.random.split(key, 10)
    return {
        "b0":   init_basic_conv(ks[0], 1024, 384, 1, 1, 0, 0),
        "b1_0": init_basic_conv(ks[1], 1024, 192, 1, 1, 0, 0),
        "b1_1": init_basic_conv(ks[2], 192, 224, 1, 7, 0, 3),
        "b1_2": init_basic_conv(ks[3], 224, 256, 7, 1, 3, 0),
        "b2_0": init_basic_conv(ks[4], 1024, 192, 1, 1, 0, 0),
        "b2_1": init_basic_conv(ks[5], 192, 192, 7, 1, 3, 0),
        "b2_2": init_basic_conv(ks[6], 192, 224, 1, 7, 0, 3),
        "b2_3": init_basic_conv(ks[7], 224, 224, 7, 1, 3, 0),
        "b2_4": init_basic_conv(ks[8], 224, 256, 1, 7, 0, 3),
        "b3_1": init_basic_conv(ks[9], 1024, 128, 1, 1, 0, 0),
    }


# ----------------------------------------------------------------------------
# Inception_B forward (Pallas)
# ----------------------------------------------------------------------------
def bconv_pallas(p, x, out_dtype=jnp.bfloat16):
    if p["kh"] == 1 and p["kw"] == 1:
        N, H, W, C = x.shape
        out = conv1x1_bn_relu(x.reshape(N * H * W, C), p["w"][0], p["b"],
                              out_dtype)
        return out.reshape(N, H, W, p["cout_p"])
    axis = 2 if p["kw"] > 1 else 1     # (1,7) -> along W, (7,1) -> along H
    return conv1d_bn_relu(x, p["w"], p["b"], axis, out_dtype)


def inception_b(params, x_nchw):
    # NCHW -> NHWC, cast once to bf16 (halves HBM traffic for all 4 branches).
    x = jnp.transpose(x_nchw, (0, 2, 3, 1)).astype(jnp.bfloat16)

    # branch0: 1x1 -> 384
    x0 = bconv_pallas(params["b0"], x, jnp.float32)
    # branch1: 1x1 -> 1x7 -> 7x1
    t = bconv_pallas(params["b1_0"], x)
    t = bconv_pallas(params["b1_1"], t)
    x1 = bconv_pallas(params["b1_2"], t, jnp.float32)
    # branch2: 1x1 -> 7x1 -> 1x7 -> 7x1 -> 1x7
    t = bconv_pallas(params["b2_0"], x)
    t = bconv_pallas(params["b2_1"], t)
    t = bconv_pallas(params["b2_2"], t)
    t = bconv_pallas(params["b2_3"], t)
    x2 = bconv_pallas(params["b2_4"], t, jnp.float32)
    # branch3: fused avgpool3x3 + 1x1 -> 128
    p3 = params["b3_1"]
    x3 = avgpool_conv_bn_relu(x, p3["w"][0], p3["b"], jnp.float32)

    # TODO(synk): could write each branch directly into its channel slice of a
    # preallocated [M, 1024] buffer instead of concatenating.
    out = jnp.concatenate([x0, x1, x2, x3], axis=-1)       # torch.cat(dim=1)
    return jnp.transpose(out, (0, 3, 1, 2))                # NHWC -> NCHW


# ----------------------------------------------------------------------------
# Pure-JAX f32 reference (same folded, UNpadded params) for a sanity check
# ----------------------------------------------------------------------------
def _ref_bconv(p, y):
    kh, kw = p["kh"], p["kw"]
    w_hwio = p["w_ref"].reshape(kh, kw, p["cin"], p["cout"])
    z = jax.lax.conv_general_dilated(
        y, w_hwio, window_strides=(1, 1),
        padding=[(p["ph"], p["ph"]), (p["pw"], p["pw"])],
        dimension_numbers=("NHWC", "HWIO", "NHWC"))
    return jnp.maximum(z + p["b_ref"], 0.0)


def _ref_avgpool(x):
    N, H, W, C = x.shape
    s = jax.lax.reduce_window(x, 0.0, jax.lax.add, (1, 3, 3, 1), (1, 1, 1, 1),
                              [(0, 0), (1, 1), (1, 1), (0, 0)])
    ih, iw = jnp.arange(H), jnp.arange(W)
    ch = 1 + (ih > 0).astype(jnp.float32) + (ih < H - 1).astype(jnp.float32)
    cw = 1 + (iw > 0).astype(jnp.float32) + (iw < W - 1).astype(jnp.float32)
    cnt = (ch[:, None] * cw[None, :])[None, :, :, None]
    return s / cnt


def inception_b_ref(params, x_nchw):
    x = jnp.transpose(x_nchw, (0, 2, 3, 1))
    x0 = _ref_bconv(params["b0"], x)
    x1 = _ref_bconv(params["b1_2"],
                    _ref_bconv(params["b1_1"], _ref_bconv(params["b1_0"], x)))
    x2 = x
    for name in ("b2_0", "b2_1", "b2_2", "b2_3", "b2_4"):
        x2 = _ref_bconv(params[name], x2)
    x3 = _ref_bconv(params["b3_1"], _ref_avgpool(x))
    out = jnp.concatenate([x0, x1, x2, x3], axis=-1)
    return jnp.transpose(out, (0, 3, 1, 2))


# ----------------------------------------------------------------------------
if __name__ == "__main__":
    key = jax.random.PRNGKey(0)
    kx, kp = jax.random.split(key)

    # Small spatial extent; channel counts are fixed by the module definition.
    N, C, H, W = 2, 1024, 8, 8
    x = jax.random.normal(kx, (N, C, H, W), jnp.float32)
    params = make_inception_b_params(kp)

    out = jax.block_until_ready(inception_b(params, x))
    assert out.shape == (N, 384 + 256 + 256 + 128, H, W), out.shape

    ref = jax.block_until_ready(inception_b_ref(params, x))
    # bf16 MXU inputs (f32 accumulation) vs. f32 reference -> relaxed tolerance.
    err = float(jnp.max(jnp.abs(out - ref)))
    ref_scale = float(jnp.max(jnp.abs(ref)))
    assert err <= 0.05 * ref_scale + 0.02, (err, ref_scale)

    print("KERNEL_OK")
</pallas_src>

<mosaic_0001>
module attributes {stable_mosaic.version = 11 : i64} {
  func.func @_mm_bn_relu_kernel(%arg0: i32, %arg1: memref<64x1024xbf16, #tpu.memory_space<vmem>>, %arg2: memref<1024x384xbf16, #tpu.memory_space<vmem>>, %arg3: memref<1x384xf32, #tpu.memory_space<vmem>>, %arg4: memref<64x384xf32, #tpu.memory_space<vmem>>) attributes {dimension_semantics = [#tpu.dimension_semantics<parallel>], iteration_bounds = array<i64: 2>, scalar_prefetch = 0 : i64, scratch_operands = 0 : i64, tpu.core_type = #tpu.core_type<tc>, window_params = [{transform_indices = @transform_0, window_bounds = array<i64: 64, 1024>}, {pipeline_mode = #tpu.pipeline_mode<synchronous>, transform_indices = @transform_1, window_bounds = array<i64: 1024, 384>}, {pipeline_mode = #tpu.pipeline_mode<synchronous>, transform_indices = @transform_2, window_bounds = array<i64: 1, 384>}, {transform_indices = @transform_3, window_bounds = array<i64: 64, 384>}]} {
    %c0 = arith.constant 0 : index
    %c0_0 = arith.constant 0 : index
    %0 = vector.load %arg1[%c0, %c0_0] : memref<64x1024xbf16, #tpu.memory_space<vmem>>, vector<64x1024xbf16>
    %c0_1 = arith.constant 0 : index
    %c0_2 = arith.constant 0 : index
    %1 = vector.load %arg2[%c0_1, %c0_2] : memref<1024x384xbf16, #tpu.memory_space<vmem>>, vector<1024x384xbf16>
    %cst = arith.constant dense<0.000000e+00> : vector<64x384xf32>
    %2 = tpu.matmul %0, %1, %cst {dimension_numbers = #tpu.dot_dimension_numbers<[1], [0], [0], [1], [0, 0, 1, 1], [], []>} : vector<64x1024xbf16>, vector<1024x384xbf16>, vector<64x384xf32> -> vector<64x384xf32>
    %c0_3 = arith.constant 0 : index
    %c0_4 = arith.constant 0 : index
    %3 = vector.load %arg3[%c0_3, %c0_4] : memref<1x384xf32, #tpu.memory_space<vmem>>, vector<1x384xf32>
    %4 = vector.broadcast %3 : vector<1x384xf32> to vector<64x384xf32>
    %5 = arith.addf %2, %4 : vector<64x384xf32>
    %cst_5 = arith.constant 0.000000e+00 : f32
    %6 = vector.broadcast %cst_5 : f32 to vector<64x384xf32>
    %7 = arith.maximumf %5, %6 : vector<64x384xf32>
    %c0_6 = arith.constant 0 : index
    %c0_7 = arith.constant 0 : index
    %8 = vector.load %arg4[%c0_6, %c0_7] : memref<64x384xf32, #tpu.memory_space<vmem>>, vector<64x384xf32>
    tpu.vector_store %arg4[%c0_6, %c0_7], %7 {strides = array<i32>} : memref<64x384xf32, #tpu.memory_space<vmem>>, vector<64x384xf32>,
    return
  }
  func.func @transform_0(%arg0: i32) -> (i32, i32) {
    %c0_i32 = arith.constant 0 : i32
    %c0_i32_0 = arith.constant 0 : i32
    return %arg0, %c0_i32 : i32, i32
  }
  func.func @transform_1(%arg0: i32) -> (i32, i32) {
    %c0_i32 = arith.constant 0 : i32
    %c0_i32_0 = arith.constant 0 : i32
    %c0_i32_1 = arith.constant 0 : i32
    return %c0_i32, %c0_i32_0 : i32, i32
  }
  func.func @transform_2(%arg0: i32) -> (i32, i32) {
    %c0_i32 = arith.constant 0 : i32
    %c0_i32_0 = arith.constant 0 : i32
    %c0_i32_1 = arith.constant 0 : i32
    return %c0_i32, %c0_i32_0 : i32, i32
  }
  func.func @transform_3(%arg0: i32) -> (i32, i32) {
    %c0_i32 = arith.constant 0 : i32
    %c0_i32_0 = arith.constant 0 : i32
    return %arg0, %c0_i32 : i32, i32
  }
}

</mosaic_0001>

<bundles_post_ra>
// kernel: tpu_custom_call.1
= control target key start
LH: loop header
LB: loop body
LE: loop exit
PB: predicated region body
PF: predicated region fallthrough
CT: control target
= control target key end

     0   :  { %8 = vsyncpa [#allocation3], 0  ;;  %s3811_s0 = inlined_call_operand.hbm [shape: bf16[128,1024], index: 0, kind: input, shape index: {}]   ;;  %s3812_s1 = inlined_call_operand.hbm [shape: bf16[1024,384], index: 1, kind: input, shape index: {}]   ;;  %s3813_s2 = inlined_call_operand.vmem [shape: f32[1,384], index: 2, kind: input, shape index: {}]   ;;  %s3814_s3 = inlined_call_operand.hbm [shape: f32[128,384], index: 3, kind: output, shape index: {}]  }
   0x1   :  { %10 = vsyncpa [#allocation3 + $0x1], 0 }
   0x2   :  { %11 = vsyncpa [#allocation6], 0 }
   0x3   :  { %12 = vsyncpa [#allocation4], 0 }
   0x4   :  { %14 = vsyncpa [#allocation4 + $0x1], 0  ;;  %s3341_s12 = smov 0   ;;  %s3343_s13 = smov 0  }
   0x5   :  { %s3345_s14 = smov 0   ;;  %s3347_s15 = smov 0  }
   0x6 LB: > { %s3362_s16 = sadd.s32 4294967295, %s3310_s15   ;;  %s2395_s17 = sadd.s32 4294967294, %s3310_s15   ;;  %s3310_s15 = sphi %s3347_s15, %s3834_s15   ;;  %s3306_s14 = sphi %s3345_s14, %s3833_s14   ;;  %s3302_s13 = sphi %s3343_s13, %s3832_s13   ;;  %s3298_s12 = sphi %s3341_s12, %s3831_s12  }
   0x7   : > { %p40_p0 = scmp.ne.s32.totalorder %s3302_s13, %s3298_s12  ;;  %p3815_p1 = scmp.eq.s32.totalorder %s3362_s16, 0 }
   0x8   : > { %p112_p3 = scmp.eq.s32.totalorder %s2395_s17, 1  ;;  %p2396_p5 = scmp.ge.s32.totalorder %s3310_s15, 1 }
   0x9   : > { %p3371_p4 = por %p3815_p1, %p40_p0  ;;  %p119_p7 = scmp.lt.s32.totalorder %s3310_s15, 3 }
   0xa   : > { %p3376_p6 = por %p112_p3, %p40_p0  ;;  %s3312_s21 = smov [#allocation5]  }
   0xb   : > { %s3818_s18 = scalar_select %p3371_p4, 1, 0 }
   0xc   : > { %s3819_s19 = scalar_select %p3376_p6, 1, 0 }
   0xd   : > { %p3381_p8 = pnand %p2396_p5, %p119_p7  ;;  %s131_s22 = sshll.u32 %s3312_s21, 4  ;;  %s3385_s22 = int_to_ptr.vmem [resolvable:$true] %s131_s22 }
   0xe   : > { %s3397_s24 = sadd.s32 1, %s3310_s15   ;;  %s27_s25 = sadd.s32 1, %s3306_s14 }
   0xf   : > { %s3820_s20 = scalar_select %p3381_p8, 1, 0 }
  0x10   : > { %p2871_p9 = pneg %p3381_p8  ;;  %s24_s26 = ssub.s32 %s3310_s15, %s3397_s24 }
  0x11   : > { %s3182_s29 = scalar_lea.hbm %s3812_s1, 24576 }
  0x12   : > { %p3392_p11 = pnand %p2871_p9, %p3815_p1  ;;  %p3183_p12 = scmp.ne.s32.totalorder %s3812_s1, %s3182_s29 }
  0x13   : > { %p3189_p5 = scmp.lt.u32.totalorder %s3182_s29, %s3812_s1 }
  0x14   : > { %p3184_p13 = pneg %p3392_p11 }
  0x16   : > { %p3185_p0 = pnand %p3184_p13, %p3183_p12 }
  0x18   : > { %p3186_p3 = pneg %p3185_p0 }
  0x1a   : > { %p3191_p7 = pnand %p3189_p5, %p3186_p3 }
  0x1c   : > { %3194 = shalt.err (!%p3191_p7)
}
  0x1d   : > { %s3195_s7 = scalar_lea.vmem %s3385_s22, 24576  ;;  %p3203_p2 = scmp.lt.s32.totalorder %s3385_s22, %s3385_s22 }
  0x1e   : > { %p3196_p9 = scmp.ne.s32.totalorder %s3385_s22, %s3195_s7  ;;  %p3204_p6 = scmp.lt.s32.totalorder %s3195_s7, %s3195_s7 }
  0x20   : > { %p3198_p10 = pnand %p3196_p9, %p3184_p13  ;;  %p3205_p4 = por %p3204_p6, %p3203_p2 }
  0x22   : > { %p3199_p1 = pneg %p3198_p10 }
  0x24   : > { %p3206_p8 = pnand %p3205_p4, %p3199_p1 }
  0x26   : > { %3209 = shalt.err (!%p3206_p8)
}
  0x27   : > { %s3313_s8 = smov 192   ;;  %s3314_s9 = smov 12  }
  0x28   : > { %2874 = dma.hbm_to_vmem [thread:$0]  (!%p3392_p11), %s3812_s1, 24576, %s3385_s22, [#allocation6], %s3313_s8, %s3313_s8, %s3314_s9  }
  0x29   : > { %p25_p2 = scmp.eq.s32.totalorder %s24_s26, 0  ;;  %p34_p1 = scmp.ne.s32.totalorder %s3306_s14, %s3302_s13 }
  0x2a   : > { %p35_p4 = scmp.eq.s32.totalorder %s3310_s15, 0  ;;  %p2884_p6 = scmp.lt.s32.totalorder %s3310_s15, 2 }
  0x2b   : > { %s3428_s17 = scalar_select %p25_p2, %s3306_s14, %s27_s25  }
  0x2c   : > { %p36_p8 = por %p35_p4, %p34_p1  ;;  %p3822_p10 = scmp.eq.s32.totalorder %s3362_s16, 1 }
  0x2d   : > { %s148_s27 = sand.u32 1, %s3306_s14   ;;  %s2636_s28 = sshll.u32 %s3310_s15, 12 }
  0x2e   : > { %p3432_p12 = por %p3822_p10, %p34_p1  ;;  %s2399_s29 = sshll.u32 %s148_s27, 8 }
  0x2f   : > { %s3441_s4 = scalar_lea.hbm %s3811_s0, %s2636_s28  ;;  %s152_s22 = scalar_lea.vmem [#allocation2], %s2399_s29 }
  0x30   : > { %s160_s25 = sshll.u32 %s152_s22, 4  ;;  %p3443_p11 = pnand %p2884_p6, %p36_p8  ;;  %s3447_s25 = int_to_ptr.vmem [resolvable:$true] %s160_s25 }
  0x31   : > { %s3449_s5 = scalar_lea.sflag [#allocation3], %s148_s27  ;;  %s3210_s6 = scalar_lea.hbm %s3441_s4, 4096 }
  0x32   : > { %p3211_p13 = scmp.ne.s32.totalorder %s3441_s4, %s3210_s6  ;;  %p3212_p0 = pneg %p3443_p11 }
  0x33   : > { %s3215_s9 = scalar_lea.hbm %s3811_s0, 8192  ;;  %p3216_p7 = scmp.lt.u32.totalorder %s3441_s4, %s3811_s0 }
  0x34   : > { %p3213_p3 = pnand %p3212_p0, %p3211_p13  ;;  %p3217_p9 = scmp.lt.u32.totalorder %s3215_s9, %s3210_s6 }
  0x35   : > { %p3219_p1 = scmp.lt.u32.totalorder %s3210_s6, %s3441_s4 }
  0x36   : > { %p3214_p5 = pneg %p3213_p3  ;;  %p3218_p2 = por %p3217_p9, %p3216_p7 }
  0x38   : > { %p3220_p4 = por %p3219_p1, %p3218_p2 }
  0x3a   : > { %p3221_p6 = pnand %p3220_p4, %p3214_p5 }
  0x3c   : > { %3224 = shalt.err (!%p3221_p6)
}
  0x3d   : > { %s3225_s27 = scalar_lea.vmem %s3447_s25, 4096  ;;  %s3315_s28 = smov [#allocation2]  }
  0x3e   : > { %p3226_p8 = scmp.ne.s32.totalorder %s3447_s25, %s3225_s27  ;;  %s3230_s29 = sshll.u32 %s3315_s28, 4  ;;  %s3231_s29 = int_to_ptr.vmem [resolvable:$false] %s3230_s29 }
  0x3f   : > { %s3232_s23 = scalar_lea.vmem %s3231_s29, 8192  ;;  %p3233_p3 = scmp.lt.s32.totalorder %s3447_s25, %s3231_s29 }
  0x40   : > { %p3228_p10 = pnand %p3226_p8, %p3212_p0  ;;  %p3234_p7 = scmp.lt.s32.totalorder %s3232_s23, %s3225_s27 }
  0x42   : > { %p3229_p13 = pneg %p3228_p10  ;;  %p3235_p9 = por %p3234_p7, %p3233_p3 }
  0x44   : > { %p3236_p2 = pnand %p3235_p9, %p3229_p13 }
  0x46   : > { %3239 = shalt.err (!%p3236_p2)
}
  0x47   : > { %s3316_s30 = smov 512   ;;  %s3317_s22 = smov 32  }
  0x48   : > { %2878 = dma.hbm_to_vmem [thread:$0]  (!%p3443_p11), %s3441_s4, 4096, %s3447_s25, %s3449_s5, %s3316_s30, %s3316_s30, %s3317_s22  }
  0x49   : > { %p3825_p0 = scmp.ne.s32.totalorder %s3820_s20, 0 }
  0x4a   : > { %s3480_s6 = sand.u32 (!%p3825_p0), 1, %s3302_s13   ;;  %p3826_p5 = scmp.ne.s32.totalorder (!%p3825_p0), %s3818_s18, 0 }
  0x4b   : > { %172 = sbr.rel (%p3825_p0) target bundleno = 539 (0x21b), region = 32  ;;  %s2404_s7 = sshll.u32 (!%p3825_p0), %s3480_s6, 8 }
  0x4c   : > { %s175_s8 = scalar_lea.sflag (!%p3825_p0), [#allocation3], %s3480_s6  ;;  %s3484_s9 = scalar_lea.vmem (!%p3825_p0), [#allocation2], %s2404_s7 }
  0x52   : > { %3285 = dma.done.wait (%p3826_p5), %s175_s8, 4096  }
  0x53   : > { %3287 = vsyncadd (%p3826_p5), %s175_s8, 4294963200  ;;  %p3827_p11 = scmp.eq.s32.totalorder %s3362_s16, 0 }
  0x55   : > { %3289 = dma.done.wait (%p3827_p11), [#allocation6], 24576   ;;  %p3828_p1 = pmov %p3827_p11 }
  0x56   : > { %v2926_v0 = vld [vmem:[#allocation5 + $0x4] ss:$12 sps:$4 sm:$0xff]   ;;  %v2930_v2 = vld [vmem:[#allocation5] ss:$12 sps:$4 sm:$0xff]   ;;  %v2932_v4 = vld [vmem:[#allocation5 + $0x1c] ss:$12 sps:$4 sm:$0xff]  }
  0x57   : > { %3291 = vsyncadd (%p3828_p1), [#allocation6], 4294942720  ;;  %v2928_v1 = vld [vmem:[#allocation5 + $0x184] ss:$12 sps:$4 sm:$0xff]   ;;  %1697 = vmatprep.subr.bf16.mxu1 %v2926_v0  ;;  %v2931_v3 = vld [vmem:[#allocation5 + $0x180] ss:$12 sps:$4 sm:$0xff]  }
  0x58   : > { %1770 = vmatprep.subr.bf16.mxu0 %v2928_v1  ;;  %1698 = vmatpush1.bf16.msra.mxu1 %v2930_v2  ;;  %v2934_v5 = vld [vmem:[#allocation5 + $0x19c] ss:$12 sps:$4 sm:$0xff]   ;;  %v2936_v6 = vld [vmem:[#allocation5 + $0x18] ss:$12 sps:$4 sm:$0xff]   ;;  %v2938_v8 = vld [vmem:[#allocation5 + $0x34] ss:$12 sps:$4 sm:$0xff]  }
  0x59   : > { %1771 = vmatpush1.bf16.msra.mxu0 %v2931_v3  ;;  %1699 = vmatprep.subr.bf16.mxu1 %v2932_v4  ;;  %v2937_v7 = vld [vmem:[#allocation5 + $0x198] ss:$12 sps:$4 sm:$0xff]   ;;  %v2940_v9 = vld [vmem:[#allocation5 + $0x1b4] ss:$12 sps:$4 sm:$0xff]   ;;  %v2942_v10 = vld [vmem:[#allocation5 + $0x30] ss:$12 sps:$4 sm:$0xff]  }
  0x5a   : > { %1772 = vmatprep.subr.bf16.mxu0 %v2934_v5  ;;  %v2943_v11 = vld [vmem:[#allocation5 + $0x1b0] ss:$12 sps:$4 sm:$0xff]   ;;  %v2944_v12 = vld [vmem:[#allocation5 + $0x4c] ss:$12 sps:$4 sm:$0xff]   ;;  %v2948_v14 = vld [vmem:[#allocation5 + $0x48] ss:$12 sps:$4 sm:$0xff]  }
  0x5b   : > { %v2946_v13 = vld [vmem:[#allocation5 + $0x1cc] ss:$12 sps:$4 sm:$0xff]   ;;  %v2949_v15 = vld [vmem:[#allocation5 + $0x1c8] ss:$12 sps:$4 sm:$0xff]   ;;  %v2950_v16 = vld [vmem:[#allocation5 + $0x64] ss:$12 sps:$4 sm:$0xff]  }
  0x5c   : > { %1700 = vmatpush1.bf16.msra.mxu1 %v2936_v6  ;;  %v2952_v17 = vld [vmem:[#allocation5 + $0x1e4] ss:$12 sps:$4 sm:$0xff]   ;;  %v2954_v18 = vld [vmem:[#allocation5 + $0x60] ss:$12 sps:$4 sm:$0xff]   ;;  %v2956_v20 = vld [vmem:[#allocation5 + $0x7c] ss:$12 sps:$4 sm:$0xff]  }
  0x5d   : > { %1773 = vmatpush1.bf16.msra.mxu0 %v2937_v7  ;;  %1701 = vmatprep.subr.bf16.mxu1 %v2938_v8  ;;  %v2955_v19 = vld [vmem:[#allocation5 + $0x1e0] ss:$12 sps:$4 sm:$0xff]   ;;  %v2958_v21 = vld [vmem:[#allocation5 + $0x1fc] ss:$12 sps:$4 sm:$0xff]   ;;  %v2960_v22 = vld [vmem:[#allocation5 + $0x78] ss:$12 sps:$4 sm:$0xff]  }
  0x5e   : > { %1774 = vmatprep.subr.bf16.mxu0 %v2940_v9  ;;  %v2961_v23 = vld [vmem:[#allocation5 + $0x1f8] ss:$12 sps:$4 sm:$0xff]   ;;  %v2962_v24 = vld [vmem:[#allocation5 + $0x94] ss:$12 sps:$4 sm:$0xff]   ;;  %v2966_v26 = vld [vmem:[#allocation5 + $0x90] ss:$12 sps:$4 sm:$0xff]  }
  0x5f   : > { %v2964_v25 = vld [vmem:[#allocation5 + $0x214] ss:$12 sps:$4 sm:$0xff]   ;;  %v2967_v27 = vld [vmem:[#allocation5 + $0x210] ss:$12 sps:$4 sm:$0xff]   ;;  %v2968_v28 = vld [vmem:[#allocation5 + $0xac] ss:$12 sps:$4 sm:$0xff]  }
  0x60   : > { %1702 = vmatpush1.bf16.msra.mxu1 %v2942_v10  ;;  %v2970_v29 = vld [vmem:[#allocation5 + $0x22c] ss:$12 sps:$4 sm:$0xff]   ;;  %v2972_v30 = vld [vmem:[#allocation5 + $0xa8] ss:$12 sps:$4 sm:$0xff]   ;;  %v2974_v32 = vld [vmem:[#allocation5 + $0xc4] ss:$12 sps:$4 sm:$0xff]  }
  0x61   : > { %1775 = vmatpush1.bf16.msra.mxu0 %v2943_v11  ;;  %1703 = vmatprep.subr.bf16.mxu1 %v2944_v12  ;;  %v2973_v31 = vld [vmem:[#allocation5 + $0x228] ss:$12 sps:$4 sm:$0xff]   ;;  %v2976_v33 = vld [vmem:[#allocation5 + $0x244] ss:$12 sps:$4 sm:$0xff]   ;;  %v2978_v34 = vld [vmem:[#allocation5 + $0xc0] ss:$12 sps:$4 sm:$0xff]  }
  0x62   : > { %1776 = vmatprep.subr.bf16.mxu0 %v2946_v13  ;;  %v2979_v35 = vld [vmem:[#allocation5 + $0x240] ss:$12 sps:$4 sm:$0xff]   ;;  %v2980_v36 = vld [vmem:[#allocation5 + $0xdc] ss:$12 sps:$4 sm:$0xff]   ;;  %v2984_v38 = vld [vmem:[#allocation5 + $0xd8] ss:$12 sps:$4 sm:$0xff]  }
  0x63   : > { %v2982_v37 = vld [vmem:[#allocation5 + $0x25c] ss:$12 sps:$4 sm:$0xff]   ;;  %v2985_v39 = vld [vmem:[#allocation5 + $0x258] ss:$12 sps:$4 sm:$0xff]   ;;  %v2986_v40 = vld [vmem:[#allocation5 + $0xf4] ss:$12 sps:$4 sm:$0xff]  }
  0x64   : > { %1704 = vmatpush1.bf16.msra.mxu1 %v2948_v14  ;;  %v2988_v41 = vld [vmem:[#allocation5 + $0x274] ss:$12 sps:$4 sm:$0xff]   ;;  %v2990_v42 = vld [vmem:[#allocation5 + $0xf0] ss:$12 sps:$4 sm:$0xff]   ;;  %v2992_v44 = vld [vmem:[#allocation5 + $0x10c] ss:$12 sps:$4 sm:$0xff]  }
  0x65   : > { %1777 = vmatpush1.bf16.msra.mxu0 %v2949_v15  ;;  %1705 = vmatprep.subr.bf16.mxu1 %v2950_v16  ;;  %v2991_v43 = vld [vmem:[#allocation5 + $0x270] ss:$12 sps:$4 sm:$0xff]   ;;  %v2994_v45 = vld [vmem:[#allocation5 + $0x28c] ss:$12 sps:$4 sm:$0xff]   ;;  %v2996_v46 = vld [vmem:[#allocation5 + $0x108] ss:$12 sps:$4 sm:$0xff]  }
  0x66   : > { %1778 = vmatprep.subr.bf16.mxu0 %v2952_v17  ;;  %v2997_v47 = vld [vmem:[#allocation5 + $0x288] ss:$12 sps:$4 sm:$0xff]   ;;  %v208_v48 = vld [vmem:[%s3484_s9] sm:$0xff]  ;;  %v3014_v0 = vld [vmem:[#allocation5 + $0x150] ss:$12 sps:$4 sm:$0xff]   ;;  %s2861_s4 = smul.u32 192, %s3480_s6 }
  0x67   : > { %v212_v49 = vld [vmem:[%s3484_s9 + $0x20] sm:$0xff]  ;;  %v209_v50 = vld [vmem:[%s3484_s9 + $0x8] sm:$0xff]  ;;  %v3015_v1 = vld [vmem:[#allocation5 + $0x2d0] ss:$12 sps:$4 sm:$0xff]   ;;  %s2862_s26 = smul.u32 3072, %s3362_s16  ;;  %s2298_s27 = scalar_lea.sflag [#allocation4], %s3480_s6 }
  0x68   : > { %1706 = vmatpush1.bf16.msra.mxu1 %v2954_v18  ;;  %v213_v51 = vld [vmem:[%s3484_s9 + $0x28] sm:$0xff]  ;;  %v2998_v52 = vld [vmem:[#allocation5 + $0x124] ss:$12 sps:$4 sm:$0xff]   ;;  %v3498_v53 = vcombine.high %v208_v48, %v212_v49  ;;  %v3010_v62 = vld [vmem:[#allocation5 + $0x154] ss:$12 sps:$4 sm:$0xff]   ;;  %v3505_v10 = vcombine.low %v208_v48, %v212_v49  ;;  %s3704_s25 = scalar_lea.vmem [#allocation7], %s2861_s4 }
  0x69   : > { %1779 = vmatpush1.bf16.msra.mxu0 %v2955_v19  ;;  %1707 = vmatprep.subr.bf16.mxu1 %v2956_v20  ;;  %v3000_v54 = vld [vmem:[#allocation5 + $0x2a4] ss:$12 sps:$4 sm:$0xff]   ;;  %v3500_v55 = vcombine.high %v209_v50, %v213_v51  ;;  %v3002_v56 = vld [vmem:[#allocation5 + $0x120] ss:$12 sps:$4 sm:$0xff]   ;;  %v3004_v58 = vld [vmem:[#allocation5 + $0x13c] ss:$12 sps:$4 sm:$0xff]   ;;  %v3507_v11 = vcombine.low %v209_v50, %v213_v51  ;;  %s3762_s11 = scalar_lea.hbm %s3814_s3, %s2862_s26 }
  0x6a   : > { %1780 = vmatprep.subr.bf16.mxu0 %v2958_v21  ;;  %1729 = vmatprep.mubr.bf16.mxu1 %v3498_v53  ;;  %v3003_v57 = vld [vmem:[#allocation5 + $0x2a0] ss:$12 sps:$4 sm:$0xff]   ;;  %v3006_v59 = vld [vmem:[#allocation5 + $0x2bc] ss:$12 sps:$4 sm:$0xff]   ;;  %v3008_v60 = vld [vmem:[#allocation5 + $0x138] ss:$12 sps:$4 sm:$0xff]  }
  0x6b   : > { %1802 = vmatprep.mubr.bf16.mxu0 %v3500_v55  ;;  %v3009_v61 = vld [vmem:[#allocation5 + $0x2b8] ss:$12 sps:$4 sm:$0xff]   ;;  %v3012_v63 = vld [vmem:[#allocation5 + $0x2d4] ss:$12 sps:$4 sm:$0xff]   ;;  %v3029_v14 = vld [vmem:[#allocation5 + $0x31c] ss:$12 sps:$4 sm:$0xff]  }
  0x6c   : > { %1708 = vmatpush1.bf16.msra.mxu1 %v2960_v22  ;;  %v3016_v2 = vld [vmem:[#allocation5 + $0x16c] ss:$12 sps:$4 sm:$0xff]   ;;  %v3020_v4 = vld [vmem:[#allocation5 + $0x168] ss:$12 sps:$4 sm:$0xff]   ;;  %v3024_v6 = vld [vmem:[#allocation5 + $0x304] ss:$12 sps:$4 sm:$0xff]  }
  0x6d   : > { %1781 = vmatpush1.bf16.msra.mxu0 %v2961_v23  ;;  %1709 = vmatprep.subr.bf16.mxu1 %v2962_v24  ;;  %v3018_v3 = vld [vmem:[#allocation5 + $0x2ec] ss:$12 sps:$4 sm:$0xff]   ;;  %v3021_v5 = vld [vmem:[#allocation5 + $0x2e8] ss:$12 sps:$4 sm:$0xff]   ;;  %v216_v9 = vld [vmem:[%s3484_s9 + $0x40] sm:$0xff]  ;;  %s2312_s5 = sshll.u32 %s3704_s25, 4  ;;  %s3764_s5 = int_to_ptr.vmem [resolvable:$true] %s2312_s5 }
  0x6e   : > { %1782 = vmatprep.subr.bf16.mxu0 %v2964_v25  ;;  %v3025_v7 = vld [vmem:[#allocation5 + $0xc8] ss:$12 sps:$4 sm:$0xff]   ;;  %v3022_v8 = vld [vmem:[#allocation5 + $0x300] ss:$12 sps:$4 sm:$0xff]   ;;  %v3027_v16 = vld [vmem:[#allocation5 + $0x318] ss:$12 sps:$4 sm:$0xff]  }
  0x6f   : > { %v220_v12 = vld [vmem:[%s3484_s9 + $0x60] sm:$0xff]  ;;  %v3026_v13 = vld [vmem:[#allocation5 + $0x8] ss:$12 sps:$4 sm:$0xff]   ;;  %v3032_v21 = vld [vmem:[#allocation5 + $0x330] ss:$12 sps:$4 sm:$0xff]   ;;  %s3240_s28 = scalar_lea.vmem %s3764_s5, 3072 }
  0x70   : > { %1710 = vmatpush1.bf16.msra.mxu1 %v2966_v26  ;;  %v3030_v15 = vld [vmem:[#allocation5 + $0xe0] ss:$12 sps:$4 sm:$0xff]   ;;  %v3510_v17 = vcombine.high %v216_v9, %v220_v12  ;;  %v3035_v20 = vld [vmem:[#allocation5 + $0xf8] ss:$12 sps:$4 sm:$0xff]   ;;  %v3516_v23 = vcombine.low %v216_v9, %v220_v12  ;;  %v3052_v49 = vld [vmem:[#allocation5 + $0x390] ss:$12 sps:$4 sm:$0xff]   ;;  %p3241_p4 = scmp.ne.s32.totalorder %s3764_s5, %s3240_s28 }
  0x71   : > { %1783 = vmatpush1.bf16.msra.mxu0 %v2967_v27  ;;  %1711 = vmatprep.subr.bf16.mxu1 %v2968_v28  ;;  %v3031_v18 = vld [vmem:[#allocation5 + $0x20] ss:$12 sps:$4 sm:$0xff]   ;;  %v3036_v25 = vld [vmem:[#allocation5 + $0x38] ss:$12 sps:$4 sm:$0xff]   ;;  %v3040_v27 = vld [vmem:[#allocation5 + $0x110] ss:$12 sps:$4 sm:$0xff]  }
  0x72   : > { %1784 = vmatprep.subr.bf16.mxu0 %v2970_v29  ;;  %v3034_v19 = vld [vmem:[#allocation5 + $0x334] ss:$12 sps:$4 sm:$0xff]   ;;  %v3039_v26 = vld [vmem:[#allocation5 + $0x34c] ss:$12 sps:$4 sm:$0xff]   ;;  %p3242_p6 = pnand %p3241_p4, %p3432_p12  ;;  %s3318_s29 = smov [#allocation7]  }
  0x73   : > { %v224_v22 = vld [vmem:[%s3484_s9 + $0x80] sm:$0xff]  ;;  %v3037_v28 = vld [vmem:[#allocation5 + $0x348] ss:$12 sps:$4 sm:$0xff]   ;;  %s3244_s23 = sshll.u32 %s3318_s29, 4  ;;  %s3245_s23 = int_to_ptr.vmem [resolvable:$false] %s3244_s23 }
  0x74   : > { %1712 = vmatpush1.bf16.msra.mxu1 %v2972_v30  ;;  %v228_v24 = vld [vmem:[%s3484_s9 + $0xa0] sm:$0xff]  ;;  %v3041_v30 = vld [vmem:[#allocation5 + $0x50] ss:$12 sps:$4 sm:$0xff]   ;;  %v225_v50 = vld [vmem:[%s3484_s9 + $0x88] sm:$0xff]  ;;  %p3243_p8 = pneg %p3242_p6  ;;  %s3246_s30 = scalar_lea.vmem %s3245_s23, 6144 }
  0x75   : > { %1785 = vmatpush1.bf16.msra.mxu0 %v2973_v31  ;;  %1713 = vmatprep.subr.bf16.mxu1 %v2974_v32  ;;  %v3519_v29 = vcombine.high %v224_v22, %v228_v24  ;;  %v3044_v31 = vld [vmem:[#allocation5 + $0x364] ss:$12 sps:$4 sm:$0xff]   ;;  %v3045_v32 = vld [vmem:[#allocation5 + $0x128] ss:$12 sps:$4 sm:$0xff]   ;;  %p3247_p10 = scmp.lt.s32.totalorder %s3764_s5, %s3245_s23  ;;  %p3248_p13 = scmp.lt.s32.totalorder %s3246_s30, %s3240_s28 }
  0x76   : > { %1786 = vmatprep.subr.bf16.mxu0 %v2976_v33  ;;  %v3042_v33 = vld [vmem:[#allocation5 + $0x360] ss:$12 sps:$4 sm:$0xff]   ;;  %v3055_v48 = vld [vmem:[#allocation5 + $0x158] ss:$12 sps:$4 sm:$0xff]  }
  0x77   : > { %v3074_v9 = vld [vmem:[#allocation5 + $0x3f4] ss:$12 sps:$4 sm:$0xff]   ;;  %v3075_v12 = vld [vmem:[#allocation5 + $0x278] ss:$12 sps:$4 sm:$0xff]   ;;  %p3249_p3 = por %p3248_p13, %p3247_p10 }
  0x78   : > { %1714 = vmatpush1.bf16.msra.mxu1 %v2978_v34  ;;  %v3046_v34 = vld [vmem:[#allocation5 + $0x68] ss:$12 sps:$4 sm:$0xff]  }
  0x79   : > { %1787 = vmatpush1.bf16.msra.mxu0 %v2979_v35  ;;  %1715 = vmatprep.subr.bf16.mxu1 %v2980_v36  ;;  %v232_v35 = vld [vmem:[%s3484_s9 + $0xc0] sm:$0xff]  ;;  %v3524_v36 = vcombine.low %v224_v22, %v228_v24  ;;  %v3085_v22 = vld [vmem:[#allocation5 + $0x2a8] ss:$12 sps:$4 sm:$0xff]   ;;  %p3250_p7 = pnand %p3249_p3, %p3243_p8 }
  0x7a   : > { %1788 = vmatprep.subr.bf16.mxu0 %v2982_v37  ;;  %v236_v37 = vld [vmem:[%s3484_s9 + $0xe0] sm:$0xff] }
  0x7b   : > { %v3540_v51 = vcombine.low %v232_v35, %v236_v37  ;;  %v3082_v24 = vld [vmem:[#allocation5 + $0x420] ss:$12 sps:$4 sm:$0xff]  }
  0x7c   : > { %1716 = vmatpush1.bf16.msra.mxu1 %v2984_v38  ;;  %v217_v38 = vld [vmem:[%s3484_s9 + $0x48] sm:$0xff] }
  0x7d   : > { %1789 = vmatpush1.bf16.msra.mxu0 %v2985_v39  ;;  %1717 = vmatprep.subr.bf16.mxu1 %v2986_v40  ;;  %v221_v39 = vld [vmem:[%s3484_s9 + $0x68] sm:$0xff] }
  0x7e   : > { %1790 = vmatprep.subr.bf16.mxu0 %v2988_v41  ;;  %v3049_v40 = vld [vmem:[#allocation5 + $0x37c] ss:$12 sps:$4 sm:$0xff]   ;;  %v3529_v41 = vcombine.high %v217_v38, %v221_v39 }
  0x80   : > { %1718 = vmatpush1.bf16.msra.mxu1 %v2990_v42  ;;  %v3531_v42 = vcombine.low %v217_v38, %v221_v39  ;;  %v3105_v38 = vld [vmem:[#allocation5 + $0x3c8] ss:$12 sps:$4 sm:$0xff]  }
  0x81   : > { %1791 = vmatpush1.bf16.msra.mxu0 %v2991_v43  ;;  %1719 = vmatprep.subr.bf16.mxu1 %v2992_v44  ;;  %v3050_v43 = vld [vmem:[#allocation5 + $0x140] ss:$12 sps:$4 sm:$0xff]   ;;  %v3533_v44 = vcombine.high %v232_v35, %v236_v37  ;;  %v3097_v35 = vld [vmem:[#allocation5 + $0x468] ss:$12 sps:$4 sm:$0xff]   ;;  %v3104_v37 = vld [vmem:[#allocation5 + $0x484] ss:$12 sps:$4 sm:$0xff]  }
  0x82   : > { %1792 = vmatprep.subr.bf16.mxu0 %v2994_v45  ;;  %v3047_v45 = vld [vmem:[#allocation5 + $0x378] ss:$12 sps:$4 sm:$0xff]  }
  0x84   : > { %1720 = vmatpush1.bf16.msra.mxu1 %v2996_v46  ;;  %v3051_v46 = vld [vmem:[#allocation5 + $0x80] ss:$12 sps:$4 sm:$0xff]  }
  0x85   : > { %1793 = vmatpush1.bf16.msra.mxu0 %v2997_v47  ;;  %1721 = vmatprep.subr.bf16.mxu1 %v2998_v52  ;;  %v3054_v47 = vld [vmem:[#allocation5 + $0x394] ss:$12 sps:$4 sm:$0xff]   ;;  %v229_v52 = vld [vmem:[%s3484_s9 + $0xa8] sm:$0xff] }
  0x86   : > { %1794 = vmatprep.subr.bf16.mxu0 %v3000_v54  ;;  %v3056_v54 = vld [vmem:[#allocation5 + $0x98] ss:$12 sps:$4 sm:$0xff]  }
  0x88   : > { %1722 = vmatpush1.bf16.msra.mxu1 %v3002_v56  ;;  %v3059_v56 = vld [vmem:[#allocation5 + $0x3ac] ss:$12 sps:$4 sm:$0xff]  }
  0x89   : > { %1795 = vmatpush1.bf16.msra.mxu0 %v3003_v57  ;;  %1723 = vmatprep.subr.bf16.mxu1 %v3004_v58  ;;  %v3543_v57 = vcombine.high %v225_v50, %v229_v52  ;;  %v3545_v58 = vcombine.low %v225_v50, %v229_v52  ;;  %v3116_v50 = vld [vmem:[#allocation5 + $0x338] ss:$12 sps:$4 sm:$0xff]   ;;  %v222_v52 = vld [vmem:[%s3484_s9 + $0x70] sm:$0xff] }
  0x8a   : > { %1796 = vmatprep.subr.bf16.mxu0 %v3006_v59  ;;  %v3060_v59 = vld [vmem:[#allocation5 + $0x170] ss:$12 sps:$4 sm:$0xff]  }
  0x8c   : > { %1724 = vmatpush1.bf16.msra.mxu1 %v3008_v60  ;;  %v3057_v60 = vld [vmem:[#allocation5 + $0x3a8] ss:$12 sps:$4 sm:$0xff]  }
  0x8d   : > { %1797 = vmatpush1.bf16.msra.mxu0 %v3009_v61  ;;  %1725 = vmatprep.subr.bf16.mxu1 %v3010_v62  ;;  %v3061_v61 = vld [vmem:[#allocation5 + $0xb0] ss:$12 sps:$4 sm:$0xff]  }
  0x8e   : > { %1798 = vmatprep.subr.bf16.mxu0 %v3012_v63  ;;  %v3064_v62 = vld [vmem:[#allocation5 + $0x3c4] ss:$12 sps:$4 sm:$0xff]   ;;  %v3065_v63 = vld [vmem:[#allocation5 + $0x248] ss:$12 sps:$4 sm:$0xff]  }
  0x90   : > { %1726 = vmatpush1.bf16.msra.mxu1 %v3014_v0  ;;  %v233_v0 = vld [vmem:[%s3484_s9 + $0xc8] sm:$0xff] }
  0x91   : > { %1799 = vmatpush1.bf16.msra.mxu0 %v3015_v1  ;;  %1727 = vmatprep.subr.bf16.mxu1 %v3016_v2  ;;  %v237_v1 = vld [vmem:[%s3484_s9 + $0xe8] sm:$0xff] }
  0x92   : > { %1800 = vmatprep.subr.bf16.mxu0 %v3018_v3  ;;  %v3062_v2 = vld [vmem:[#allocation5 + $0x3c0] ss:$12 sps:$4 sm:$0xff]   ;;  %v3066_v3 = vld [vmem:[#allocation5 + $0x188] ss:$12 sps:$4 sm:$0xff]  }
  0x94   : > { %1728 = vmatpush1.bf16.msra.mxu1 %v3020_v4  ;;  %v3553_v4 = vcombine.high %v233_v0, %v237_v1 }
  0x95   : > { %1801 = vmatpush1.bf16.msra.mxu0 %v3021_v5  ;;  %2637 = vmatprep.subr.bf16.mxu1 %v3025_v7  ;;  %v3555_v5 = vcombine.low %v233_v0, %v237_v1  ;;  %v3070_v7 = vld [vmem:[#allocation5 + $0x260] ss:$12 sps:$4 sm:$0xff]   ;;  %v226_v0 = vld [vmem:[%s3484_s9 + $0x90] sm:$0xff] }
  0x96   : > { %1843 = vmatprep.subr.bf16.mxu0 %v3024_v6  ;;  %v3069_v6 = vld [vmem:[#allocation5 + $0x3dc] ss:$12 sps:$4 sm:$0xff]   ;;  %v230_v1 = vld [vmem:[%s3484_s9 + $0xb0] sm:$0xff] }
  0x97   : > { %1730 = vmatmul.mubr.bf16.vlgmr.msra.gmra.mrb[0].mxu1 %v3505_v10 }
  0x98   : > { %1803 = vmatmul.mubr.bf16.vlgmr.msra.gmra.mrb[0].mxu0 %v3507_v11  ;;  %2638 = vmatpush3.bf16.msra.mxu1 %v3026_v13  ;;  %v210_v13 = vld [vmem:[%s3484_s9 + $0x10] sm:$0xff] }
  0x99   : > { %1844 = vmatpush1.bf16.msra.mxu0 %v3022_v8  ;;  %2639 = vmatprep.subr.bf16.mxu1 %v3030_v15  ;;  %v3067_v8 = vld [vmem:[#allocation5 + $0x3d8] ss:$12 sps:$4 sm:$0xff]   ;;  %v3072_v15 = vld [vmem:[#allocation5 + $0x3f0] ss:$12 sps:$4 sm:$0xff]  }
  0x9a   : > { %1845 = vmatprep.subr.bf16.mxu0 %v3029_v14  ;;  %1739 = vmatprep.mubr.bf16.mxu1 %v3510_v17  ;;  %v214_v14 = vld [vmem:[%s3484_s9 + $0x30] sm:$0xff] }
  0x9b   : > { %1812 = vmatprep.mubr.bf16.mxu0 %v3529_v41  ;;  %v3572_v39 = vcombine.low %v210_v13, %v214_v14 }
  0x9c   : > { %2640 = vmatpush3.bf16.msra.mxu1 %v3031_v18  ;;  %v3076_v18 = vld [vmem:[#allocation5 + $0x1b8] ss:$12 sps:$4 sm:$0xff]  }
  0x9d   : > { %1846 = vmatpush1.bf16.msra.mxu0 %v3027_v16  ;;  %2641 = vmatprep.subr.bf16.mxu1 %v3035_v20  ;;  %v3563_v16 = vcombine.high %v210_v13, %v214_v14  ;;  %v3077_v20 = vld [vmem:[#allocation5 + $0x408] ss:$12 sps:$4 sm:$0xff]   ;;  %v3132_v14 = vld [vmem:[#allocation5 + $0x510] ss:$12 sps:$4 sm:$0xff]  }
  0x9e   : > { %1847 = vmatprep.subr.bf16.mxu0 %v3034_v19  ;;  %v3080_v19 = vld [vmem:[#allocation5 + $0x290] ss:$12 sps:$4 sm:$0xff]  }
  0x9f   : > { %1740 = vmatmul.mubr.bf16.gmra.mrb[4].mxu1 %v3516_v23  ;;  %v238_v13 = vld [vmem:[%s3484_s9 + $0xf0] sm:$0xff] }
  0xa0   : > { %2642 = vmatpush3.bf16.msra.mxu1 %v3036_v25  ;;  %1749 = vmatprep.mubr.bf16.mxu1 %v3519_v29  ;;  %v3086_v25 = vld [vmem:[#allocation5 + $0x1e8] ss:$12 sps:$4 sm:$0xff]  }
  0xa1   : > { %1848 = vmatpush1.bf16.msra.mxu0 %v3032_v21  ;;  %2643 = vmatprep.subr.bf16.mxu1 %v3040_v27  ;;  %v3081_v21 = vld [vmem:[#allocation5 + $0x1d0] ss:$12 sps:$4 sm:$0xff]   ;;  %v3090_v27 = vld [vmem:[#allocation5 + $0x2c0] ss:$12 sps:$4 sm:$0xff]  }
  0xa2   : > { %1849 = vmatprep.subr.bf16.mxu0 %v3039_v26  ;;  %1813 = vmatmul.mubr.bf16.gmra.mrb[4].mxu0 %v3531_v42  ;;  %v3089_v26 = vld [vmem:[#allocation5 + $0x43c] ss:$12 sps:$4 sm:$0xff]  }
  0xa3   : > { %1822 = vmatprep.mubr.bf16.mxu0 %v3543_v57 }
  0xa4   : > { %2644 = vmatpush3.bf16.msra.mxu1 %v3041_v30  ;;  %v3094_v30 = vld [vmem:[#allocation5 + $0x454] ss:$12 sps:$4 sm:$0xff]  }
  0xa5   : > { %1850 = vmatpush1.bf16.msra.mxu0 %v3037_v28  ;;  %2645 = vmatprep.subr.bf16.mxu1 %v3045_v32  ;;  %v3091_v28 = vld [vmem:[#allocation5 + $0x200] ss:$12 sps:$4 sm:$0xff]   ;;  %v3096_v32 = vld [vmem:[#allocation5 + $0x218] ss:$12 sps:$4 sm:$0xff]  }
  0xa6   : > { %1851 = vmatprep.subr.bf16.mxu0 %v3044_v31  ;;  %v3095_v31 = vld [vmem:[#allocation5 + $0x2d8] ss:$12 sps:$4 sm:$0xff]  }
  0xa7   : > { %1750 = vmatmul.mubr.bf16.gmra.mrb[8].mxu1 %v3524_v36 }
  0xa8   : > { %2646 = vmatpush3.bf16.msra.mxu1 %v3046_v34  ;;  %1759 = vmatprep.mubr.bf16.mxu1 %v3533_v44  ;;  %v3100_v34 = vld [vmem:[#allocation5 + $0x2f0] ss:$12 sps:$4 sm:$0xff]  }
  0xa9   : > { %1852 = vmatpush1.bf16.msra.mxu0 %v3042_v33  ;;  %2647 = vmatprep.subr.bf16.mxu1 %v3050_v43  ;;  %v3099_v33 = vld [vmem:[#allocation5 + $0x46c] ss:$12 sps:$4 sm:$0xff]   ;;  %v3106_v43 = vld [vmem:[#allocation5 + $0x308] ss:$12 sps:$4 sm:$0xff]  }
  0xaa   : > { %1853 = vmatprep.subr.bf16.mxu0 %v3049_v40  ;;  %1823 = vmatmul.mubr.bf16.gmra.mrb[8].mxu0 %v3545_v58  ;;  %v3102_v40 = vld [vmem:[#allocation5 + $0x480] ss:$12 sps:$4 sm:$0xff]  }
  0xab   : > { %1832 = vmatprep.mubr.bf16.mxu0 %v3553_v4 }
  0xac   : > { %2648 = vmatpush3.bf16.msra.mxu1 %v3051_v46  ;;  %v3107_v46 = vld [vmem:[#allocation5 + $0x498] ss:$12 sps:$4 sm:$0xff]  }
  0xad   : > { %1854 = vmatpush1.bf16.msra.mxu0 %v3047_v45  ;;  %2649 = vmatprep.subr.bf16.mxu1 %v3055_v48  ;;  %v3110_v45 = vld [vmem:[#allocation5 + $0x3e0] ss:$12 sps:$4 sm:$0xff]   ;;  %v3115_v48 = vld [vmem:[#allocation5 + $0x3f8] ss:$12 sps:$4 sm:$0xff]  }
  0xae   : > { %1855 = vmatprep.subr.bf16.mxu0 %v3054_v47  ;;  %v3111_v47 = vld [vmem:[#allocation5 + $0x320] ss:$12 sps:$4 sm:$0xff]  }
  0xaf   : > { %1760 = vmatmul.mubr.bf16.gmra.mrb[12].mxu1 %v3540_v51 }
  0xb0   : > { %2650 = vmatpush3.bf16.msra.mxu1 %v3056_v54  ;;  %2021 = vmatprep.mubr.bf16.mxu1 %v3498_v53  ;;  %v3071_v53 = vld [vmem:[#allocation5 + $0x1a0] ss:$12 sps:$4 sm:$0xff]  }
  0xb1   : > { %1856 = vmatpush1.bf16.msra.mxu0 %v3052_v49  ;;  %2651 = vmatprep.subr.bf16.mxu1 %v3060_v59  ;;  %v3112_v49 = vld [vmem:[#allocation5 + $0x4b0] ss:$12 sps:$4 sm:$0xff]   ;;  %v3119_v54 = vld [vmem:[#allocation5 + $0x4cc] ss:$12 sps:$4 sm:$0xff]  }
  0xb2   : > { %1857 = vmatprep.subr.bf16.mxu0 %v3059_v56  ;;  %1833 = vmatmul.mubr.bf16.gmra.mrb[12].mxu0 %v3555_v5  ;;  %v3120_v59 = vld [vmem:[#allocation5 + $0x410] ss:$12 sps:$4 sm:$0xff]  }
  0xb3   : > { %1875 = vmatprep.mubr.bf16.mxu0 %v3563_v16 }
  0xb4   : > { %2652 = vmatpush3.bf16.msra.mxu1 %v3061_v61  ;;  %v3124_v61 = vld [vmem:[#allocation5 + $0x4e4] ss:$12 sps:$4 sm:$0xff]  }
  0xb5   : > { %1858 = vmatpush1.bf16.msra.mxu0 %v3057_v60  ;;  %2677 = vmatprep.subr.bf16.mxu1 %v3065_v63  ;;  %v3121_v60 = vld [vmem:[#allocation5 + $0x350] ss:$12 sps:$4 sm:$0xff]   ;;  %v3122_v63 = vld [vmem:[#allocation5 + $0x4e0] ss:$12 sps:$4 sm:$0xff]  }
  0xb6   : > { %1859 = vmatprep.subr.bf16.mxu0 %v3064_v62  ;;  %v3125_v62 = vld [vmem:[#allocation5 + $0x428] ss:$12 sps:$4 sm:$0xff]  }
  0xb7   : > { %2022 = vmatmul.mubr.bf16.vlgmr.msra.gmra.mrb[16].mxu1 %v3505_v10  ;;  %v3079_v10 = vld [vmem:[#allocation5 + $0x40c] ss:$12 sps:$4 sm:$0xff]  }
  0xb8   : > { %2678 = vmatpush3.bf16.msra.mxu1 %v3066_v3  ;;  %2029 = vmatprep.mubr.bf16.mxu1 %v3510_v17  ;;  %v3084_v17 = vld [vmem:[#allocation5 + $0x424] ss:$12 sps:$4 sm:$0xff]   ;;  %v3129_v3 = vld [vmem:[#allocation5 + $0x4fc] ss:$12 sps:$4 sm:$0xff]  }
  0xb9   : > { %1860 = vmatpush1.bf16.msra.mxu0 %v3062_v2  ;;  %2679 = vmatprep.subr.bf16.mxu1 %v3070_v7  ;;  %v3126_v2 = vld [vmem:[#allocation5 + $0x368] ss:$12 sps:$4 sm:$0xff]   ;;  %v3130_v7 = vld [vmem:[#allocation5 + $0x440] ss:$12 sps:$4 sm:$0xff]  }
  0xba   : > { %1861 = vmatprep.subr.bf16.mxu0 %v3069_v6  ;;  %v3591_v6 = vcombine.low %v226_v0, %v230_v1 }
  0xbc   : > { %2680 = vmatpush3.bf16.msra.mxu1 %v3071_v53  ;;  %v3134_v53 = vld [vmem:[#allocation5 + $0x514] ss:$12 sps:$4 sm:$0xff]  }
  0xbd   : > { %1862 = vmatpush1.bf16.msra.mxu0 %v3067_v8  ;;  %2681 = vmatprep.subr.bf16.mxu1 %v3075_v12  ;;  %v3131_v8 = vld [vmem:[#allocation5 + $0x380] ss:$12 sps:$4 sm:$0xff]   ;;  %v234_v12 = vld [vmem:[%s3484_s9 + $0xd0] sm:$0xff] }
  0xbe   : > { %1863 = vmatprep.subr.bf16.mxu0 %v3074_v9  ;;  %v3135_v9 = vld [vmem:[#allocation5 + $0x458] ss:$12 sps:$4 sm:$0xff]  }
  0xbf   : > { %2030 = vmatmul.mubr.bf16.gmra.mrb[20].mxu1 %v3516_v23  ;;  %v3087_v23 = vld [vmem:[#allocation5 + $0x438] ss:$12 sps:$4 sm:$0xff]  }
  0xc0   : > { %2682 = vmatpush3.bf16.msra.mxu1 %v3076_v18  ;;  %2037 = vmatprep.mubr.bf16.mxu1 %v3519_v29  ;;  %v3092_v29 = vld [vmem:[#allocation5 + $0x450] ss:$12 sps:$4 sm:$0xff]   ;;  %v3599_v18 = vcombine.high %v234_v12, %v238_v13 }
  0xc1   : > { %1864 = vmatpush1.bf16.msra.mxu0 %v3072_v15  ;;  %2683 = vmatprep.subr.bf16.mxu1 %v3080_v19  ;;  %v3136_v15 = vld [vmem:[#allocation5 + $0x398] ss:$12 sps:$4 sm:$0xff]   ;;  %v3140_v19 = vld [vmem:[#allocation5 + $0x470] ss:$12 sps:$4 sm:$0xff]  }
  0xc2   : > { %1865 = vmatprep.subr.bf16.mxu0 %v3079_v10  ;;  %v3601_v10 = vcombine.low %v234_v12, %v238_v13 }
  0xc4   : > { %2684 = vmatpush3.bf16.msra.mxu1 %v3081_v21  ;;  %v3144_v21 = vld [vmem:[#allocation5 + $0x544] ss:$12 sps:$4 sm:$0xff]  }
  0xc5   : > { %1866 = vmatpush1.bf16.msra.mxu0 %v3077_v20  ;;  %2685 = vmatprep.subr.bf16.mxu1 %v3085_v22  ;;  %v3137_v20 = vld [vmem:[#allocation5 + $0x528] ss:$12 sps:$4 sm:$0xff]   ;;  %v3607_v22 = vld [vmem:[%s3484_s9 + $0x18] sm:$0xff] }
  0xc6   : > { %1867 = vmatprep.subr.bf16.mxu0 %v3084_v17  ;;  %v3145_v17 = vld [vmem:[#allocation5 + $0x548] ss:$12 sps:$4 sm:$0xff]  }
  0xc7   : > { %2038 = vmatmul.mubr.bf16.gmra.mrb[24].mxu1 %v3524_v36  ;;  %v3101_v36 = vld [vmem:[#allocation5 + $0x230] ss:$12 sps:$4 sm:$0xff]  }
  0xc8   : > { %2686 = vmatpush3.bf16.msra.mxu1 %v3086_v25  ;;  %2045 = vmatprep.mubr.bf16.mxu1 %v3533_v44  ;;  %v3109_v44 = vld [vmem:[#allocation5 + $0x49c] ss:$12 sps:$4 sm:$0xff]  }
  0xc9   : > { %1868 = vmatpush1.bf16.msra.mxu0 %v3082_v24  ;;  %2687 = vmatprep.subr.bf16.mxu1 %v3090_v27  ;;  %v3610_v24 = vld [vmem:[%s3484_s9 + $0x38] sm:$0xff] }
  0xca   : > { %1869 = vmatprep.subr.bf16.mxu0 %v3089_v26  ;;  %v3615_v25 = vcombine.high %v3607_v22, %v3610_v24  ;;  %v3146_v26 = vld [vmem:[#allocation5 + $0x488] ss:$12 sps:$4 sm:$0xff]  }
  0xcb   : > { %v3149_v27 = vld [vmem:[#allocation5 + $0x55c] ss:$12 sps:$4 sm:$0xff]  }
  0xcc   : > { %2688 = vmatpush3.bf16.msra.mxu1 %v3091_v28  ;;  %v3147_v28 = vld [vmem:[#allocation5 + $0x558] ss:$12 sps:$4 sm:$0xff]  }
  0xcd   : > { %1870 = vmatpush1.bf16.msra.mxu0 %v3087_v23  ;;  %2689 = vmatprep.subr.bf16.mxu1 %v3095_v31  ;;  %v3150_v23 = vld [vmem:[#allocation5 + $0x560] ss:$12 sps:$4 sm:$0xff]   ;;  %v3155_v31 = vld [vmem:[#allocation5 + $0x578] ss:$12 sps:$4 sm:$0xff]  }
  0xce   : > { %1871 = vmatprep.subr.bf16.mxu0 %v3094_v30  ;;  %v3154_v30 = vld [vmem:[#allocation5 + $0x574] ss:$12 sps:$4 sm:$0xff]  }
  0xcf   : > { %2046 = vmatmul.mubr.bf16.gmra.mrb[28].mxu1 %v3540_v51  ;;  %v218_v51 = vld [vmem:[%s3484_s9 + $0x50] sm:$0xff] }
  0xd0   : > { %2690 = vmatpush3.bf16.msra.mxu1 %v3096_v32  ;;  %2086 = vmatprep.mubr.bf16.mxu1 %v3500_v55  ;;  %v3114_v55 = vld [vmem:[#allocation5 + $0x4b4] ss:$12 sps:$4 sm:$0xff]   ;;  %v3579_v56 = vcombine.high %v218_v51, %v222_v52  ;;  %v3156_v32 = vld [vmem:[#allocation5 + $0x4b8] ss:$12 sps:$4 sm:$0xff]  }
  0xd1   : > { %1872 = vmatpush1.bf16.msra.mxu0 %v3092_v29  ;;  %2691 = vmatprep.subr.bf16.mxu1 %v3100_v34  ;;  %v3152_v29 = vld [vmem:[#allocation5 + $0x570] ss:$12 sps:$4 sm:$0xff]  }
  0xd2   : > { %1873 = vmatprep.subr.bf16.mxu0 %v3099_v33  ;;  %v3159_v33 = vld [vmem:[#allocation5 + $0x58c] ss:$12 sps:$4 sm:$0xff]   ;;  %v3160_v34 = vld [vmem:[#allocation5 + $0x590] ss:$12 sps:$4 sm:$0xff]  }
  0xd4   : > { %2692 = vmatpush3.bf16.msra.mxu1 %v3101_v36  ;;  %v3161_v36 = vld [vmem:[#allocation5 + $0x4d0] ss:$12 sps:$4 sm:$0xff]  }
  0xd5   : > { %1874 = vmatpush1.bf16.msra.mxu0 %v3097_v35  ;;  %2717 = vmatprep.subr.bf16.mxu1 %v3105_v38  ;;  %v3157_v35 = vld [vmem:[#allocation5 + $0x588] ss:$12 sps:$4 sm:$0xff]  }
  0xd6   : > { %1916 = vmatprep.subr.bf16.mxu0 %v3104_v37  ;;  %v3164_v37 = vld [vmem:[#allocation5 + $0x5a4] ss:$12 sps:$4 sm:$0xff]   ;;  %v3165_v38 = vld [vmem:[#allocation5 + $0x5a8] ss:$12 sps:$4 sm:$0xff]  }
  0xd7   : > { %2087 = vmatmul.mubr.bf16.vlgmr.msra.gmra.mrb[32].mxu1 %v3507_v11  ;;  %v3581_v11 = vcombine.low %v218_v51, %v222_v52  ;;  %v3180_v51 = vld [vmem:[#allocation5 + $0x5f0] ss:$12 sps:$4 sm:$0xff]   ;;  %v3177_v52 = vld [vmem:[#allocation5 + $0x5e8] ss:$12 sps:$4 sm:$0xff]  }
  0xd8   : > { %1876 = vmatmul.mubr.bf16.vlgmr.msra.gmra.mrb[0].mxu0 %v3572_v39  ;;  %2718 = vmatpush3.bf16.msra.mxu1 %v3106_v43  ;;  %v3169_v43 = vld [vmem:[#allocation5 + $0x5bc] ss:$12 sps:$4 sm:$0xff]  }
  0xd9   : > { %1917 = vmatpush1.bf16.msra.mxu0 %v3102_v40  ;;  %2719 = vmatprep.subr.bf16.mxu1 %v3110_v45  ;;  %v3166_v40 = vld [vmem:[#allocation5 + $0x4e8] ss:$12 sps:$4 sm:$0xff]   ;;  %v3167_v45 = vld [vmem:[#allocation5 + $0x5b8] ss:$12 sps:$4 sm:$0xff]  }
  0xda   : > { %1918 = vmatprep.subr.bf16.mxu0 %v3109_v44  ;;  %2094 = vmatprep.mubr.bf16.mxu1 %v3529_v41  ;;  %v3117_v41 = vld [vmem:[#allocation5 + $0x4c8] ss:$12 sps:$4 sm:$0xff]   ;;  %v3170_v44 = vld [vmem:[#allocation5 + $0x5c0] ss:$12 sps:$4 sm:$0xff]  }
  0xdb   : > { %1885 = vmatprep.mubr.bf16.mxu0 %v3579_v56 }
  0xdc   : > { %2720 = vmatpush3.bf16.msra.mxu1 %v3111_v47  ;;  %v3174_v47 = vld [vmem:[#allocation5 + $0x5d4] ss:$12 sps:$4 sm:$0xff]  }
  0xdd   : > { %1919 = vmatpush1.bf16.msra.mxu0 %v3107_v46  ;;  %2721 = vmatprep.subr.bf16.mxu1 %v3115_v48  ;;  %v3171_v46 = vld [vmem:[#allocation5 + $0x500] ss:$12 sps:$4 sm:$0xff]   ;;  %v3172_v48 = vld [vmem:[#allocation5 + $0x5d0] ss:$12 sps:$4 sm:$0xff]  }
  0xde   : > { %1920 = vmatprep.subr.bf16.mxu0 %v3114_v55  ;;  %v3175_v55 = vld [vmem:[#allocation5 + $0x5d8] ss:$12 sps:$4 sm:$0xff]  }
  0xdf   : > { %2095 = vmatmul.mubr.bf16.gmra.mrb[36].mxu1 %v3531_v42  ;;  %v3589_v42 = vcombine.high %v226_v0, %v230_v1  ;;  %v235_v0 = vld [vmem:[%s3484_s9 + $0xd8] sm:$0xff] }
  0xe0   : > { %1886 = vmatmul.mubr.bf16.gmra.mrb[4].mxu0 %v3581_v11  ;;  %2722 = vmatpush3.bf16.msra.mxu1 %v3116_v50  ;;  %v3179_v50 = vld [vmem:[#allocation5 + $0x5ec] ss:$12 sps:$4 sm:$0xff]  }
  0xe1   : > { %1921 = vmatpush1.bf16.msra.mxu0 %v3112_v49  ;;  %2723 = vmatprep.subr.bf16.mxu1 %v3120_v59  ;;  %v3176_v49 = vld [vmem:[#allocation5 + $0x518] ss:$12 sps:$4 sm:$0xff]   ;;  %v2412_v59 = vcombine.low %v3607_v22, %v3610_v24 }
  0xe2   : > { %1922 = vmatprep.subr.bf16.mxu0 %v3119_v54  ;;  %2102 = vmatprep.mubr.bf16.mxu1 %v3543_v57  ;;  %v3127_v57 = vld [vmem:[#allocation5 + $0x4f8] ss:$12 sps:$4 sm:$0xff]   ;;  %v3181_v54 = vld [vmem:[#allocation5 + $0x530] ss:$12 sps:$4 sm:$0xff]  }
  0xe3   : > { %1895 = vmatprep.mubr.bf16.mxu0 %v3589_v42  ;;  %v239_v1 = vld [vmem:[%s3484_s9 + $0xf8] sm:$0xff] }
  0xe4   : > { %2724 = vmatpush3.bf16.msra.mxu1 %v3121_v60  ;;  %v227_v60 = vld [vmem:[%s3484_s9 + $0x98] sm:$0xff] }
  0xe5   : > { %1923 = vmatpush1.bf16.msra.mxu0 %v3117_v41  ;;  %2725 = vmatprep.subr.bf16.mxu1 %v3125_v62 }
  0xe6   : > { %1924 = vmatprep.subr.bf16.mxu0 %v3124_v61  ;;  %v231_v61 = vld [vmem:[%s3484_s9 + $0xb8] sm:$0xff] }
  0xe7   : > { %2103 = vmatmul.mubr.bf16.gmra.mrb[40].mxu1 %v3545_v58  ;;  %v3139_v58 = vld [vmem:[#allocation5 + $0x52c] ss:$12 sps:$4 sm:$0xff]  }
  0xe8   : > { %1896 = vmatmul.mubr.bf16.gmra.mrb[8].mxu0 %v3591_v6  ;;  %2726 = vmatpush3.bf16.msra.mxu1 %v3126_v2  ;;  %v2428_v2 = vcombine.low %v227_v60, %v231_v61 }
  0xe9   : > { %1925 = vmatpush1.bf16.msra.mxu0 %v3122_v63  ;;  %2727 = vmatprep.subr.bf16.mxu1 %v3130_v7  ;;  %v2429_v63 = vcombine.high %v227_v60, %v231_v61 }
  0xea   : > { %1926 = vmatprep.subr.bf16.mxu0 %v3129_v3  ;;  %2110 = vmatprep.mubr.bf16.mxu1 %v3553_v4  ;;  %v3141_v4 = vld [vmem:[#allocation5 + $0x3b0] ss:$12 sps:$4 sm:$0xff]   ;;  %v2437_v3 = vcombine.high %v235_v0, %v239_v1 }
  0xeb   : > { %1905 = vmatprep.mubr.bf16.mxu0 %v3599_v18 }
  0xec   : > { %2728 = vmatpush3.bf16.msra.mxu1 %v3131_v8 }
  0xed   : > { %1927 = vmatpush1.bf16.msra.mxu0 %v3127_v57  ;;  %2729 = vmatprep.subr.bf16.mxu1 %v3135_v9 }
  0xee   : > { %1928 = vmatprep.subr.bf16.mxu0 %v3134_v53 }
  0xef   : > { %2111 = vmatmul.mubr.bf16.gmra.mrb[44].mxu1 %v3555_v5  ;;  %v3142_v5 = vld [vmem:[#allocation5 + $0x540] ss:$12 sps:$4 sm:$0xff]  }
  0xf0   : > { %1906 = vmatmul.mubr.bf16.gmra.mrb[12].mxu0 %v3601_v10  ;;  %2730 = vmatpush3.bf16.msra.mxu1 %v3136_v15 }
  0xf1   : > { %1929 = vmatpush1.bf16.msra.mxu0 %v3132_v14  ;;  %2731 = vmatprep.subr.bf16.mxu1 %v3140_v19 }
  0xf2   : > { %1930 = vmatprep.subr.bf16.mxu0 %v3139_v58  ;;  %2151 = vmatprep.mubr.bf16.mxu1 %v3563_v16  ;;  %v3151_v16 = vld [vmem:[#allocation5 + $0x4a0] ss:$12 sps:$4 sm:$0xff]  }
  0xf3   : > { %1948 = vmatprep.mubr.bf16.mxu0 %v3615_v25 }
  0xf4   : > { %2732 = vmatpush3.bf16.msra.mxu1 %v3141_v4 }
  0xf5   : > { %1931 = vmatpush1.bf16.msra.mxu0 %v3137_v20  ;;  %2757 = vmatprep.subr.bf16.mxu1 %v3145_v17 }
  0xf6   : > { %1932 = vmatprep.subr.bf16.mxu0 %v3144_v21 }
  0xf7   : > { %2152 = vmatmul.mubr.bf16.vlgmr.msra.gmra.mrb[48].mxu1 %v3572_v39  ;;  %v3162_v39 = vld [vmem:[#allocation5 + $0x5a0] ss:$12 sps:$4 sm:$0xff]  }
  0xf8   : > { %2758 = vmatpush3.bf16.msra.mxu1 %v3146_v26  ;;  %2159 = vmatprep.mubr.bf16.mxu1 %v3579_v56  ;;  %v219_v56 = vld [vmem:[%s3484_s9 + $0x58] sm:$0xff] }
  0xf9   : > { %1933 = vmatpush1.bf16.msra.mxu0 %v3142_v5  ;;  %2759 = vmatprep.subr.bf16.mxu1 %v3150_v23 }
  0xfa   : > { %1934 = vmatprep.subr.bf16.mxu0 %v3149_v27 }
  0xfc   : > { %2760 = vmatpush3.bf16.msra.mxu1 %v3151_v16 }
  0xfd   : > { %1935 = vmatpush1.bf16.msra.mxu0 %v3147_v28  ;;  %2761 = vmatprep.subr.bf16.mxu1 %v3155_v31 }
  0xfe   : > { %1936 = vmatprep.subr.bf16.mxu0 %v3154_v30 }
  0xff   : > { %2160 = vmatmul.mubr.bf16.gmra.mrb[52].mxu1 %v3581_v11  ;;  %v223_v11 = vld [vmem:[%s3484_s9 + $0x78] sm:$0xff] }
 0x100   : > { %2762 = vmatpush3.bf16.msra.mxu1 %v3156_v32  ;;  %2167 = vmatprep.mubr.bf16.mxu1 %v3589_v42  ;;  %v2421_v41 = vcombine.high %v219_v56, %v223_v11  ;;  %v2420_v62 = vcombine.low %v219_v56, %v223_v11  ;;  %v2436_v42 = vcombine.low %v235_v0, %v239_v1 }
 0x101   : > { %1937 = vmatpush1.bf16.msra.mxu0 %v3152_v29  ;;  %2763 = vmatprep.subr.bf16.mxu1 %v3160_v34 }
 0x102   : > { %1938 = vmatprep.subr.bf16.mxu0 %v3159_v33 }
 0x104   : > { %2764 = vmatpush3.bf16.msra.mxu1 %v3161_v36 }
 0x105   : > { %1939 = vmatpush1.bf16.msra.mxu0 %v3157_v35  ;;  %2765 = vmatprep.subr.bf16.mxu1 %v3165_v38  ;;  %v498_v35 = vlaneseq }
 0x106   : > { %1940 = vmatprep.subr.bf16.mxu0 %v3164_v37 }
 0x107   : > { %2168 = vmatmul.mubr.bf16.gmra.mrb[56].mxu1 %v3591_v6  ;;  %v3666_v37 = vshrl.u32 %v498_v35, 7 }
 0x108   : > { %2766 = vmatpush3.bf16.msra.mxu1 %v3166_v40  ;;  %2175 = vmatprep.mubr.bf16.mxu1 %v3599_v18 }
 0x109   : > { %1941 = vmatpush1.bf16.msra.mxu0 %v3162_v39  ;;  %2767 = vmatprep.subr.bf16.mxu1 %v3170_v44  ;;  %v508_v40 = vsub.s32 2, %v3666_v37 }
 0x10a   : > { %1942 = vmatprep.subr.bf16.mxu0 %v3169_v43 }
 0x10c   : > { %2768 = vmatpush3.bf16.msra.mxu1 %v3171_v46 }
 0x10d   : > { %1943 = vmatpush1.bf16.msra.mxu0 %v3167_v45  ;;  %2769 = vmatprep.subr.bf16.mxu1 %v3175_v55 }
 0x10e   : > { %1944 = vmatprep.subr.bf16.mxu0 %v3174_v47  ;;  %v3672_v47 = vld [vmem:[%s3813_s2] sm:$0x7] }
 0x10f   : > { %2176 = vmatmul.mubr.bf16.gmra.mrb[60].mxu1 %v3601_v10  ;;  %v509_v55 = vrot.slane %v3672_v47, %v508_v40 }
 0x110   : > { %2770 = vmatpush3.bf16.msra.mxu1 %v3176_v49  ;;  %2216 = vmatprep.mubr.bf16.mxu1 %v3615_v25 }
 0x111   : > { %1945 = vmatpush1.bf16.msra.mxu0 %v3172_v48  ;;  %2771 = vmatprep.subr.bf16.mxu1 %v3180_v51 }
 0x112   : > { %1946 = vmatprep.subr.bf16.mxu0 %v3179_v50 }
 0x114   : > { %2772 = vmatpush3.bf16.msra.mxu1 %v3181_v54 }
 0x115   : > { %1947 = vmatpush1.bf16.msra.mxu0 %v3177_v52 }
 0x117   : > { %2217 = vmatmul.mubr.bf16.vlgmr.msra.gmra.mrb[64].mxu1 %v2412_v59 }
 0x118   : > { %1949 = vmatmul.mubr.bf16.vlgmr.msra.gmra.mrb[0].mxu0 %v2412_v59  ;;  %2224 = vmatprep.mubr.bf16.mxu1 %v2421_v41 }
 0x119   : > { %1958 = vmatprep.mubr.bf16.mxu0 %v2421_v41 }
 0x11f   : > { %2225 = vmatmul.mubr.bf16.gmra.mrb[68].mxu1 %v2420_v62 }
 0x120   : > { %1959 = vmatmul.mubr.bf16.gmra.mrb[4].mxu0 %v2420_v62  ;;  %2232 = vmatprep.mubr.bf16.mxu1 %v2429_v63 }
 0x121   : > { %1968 = vmatprep.mubr.bf16.mxu0 %v2429_v63 }
 0x127   : > { %2233 = vmatmul.mubr.bf16.gmra.mrb[72].mxu1 %v2428_v2 }
 0x128   : > { %1969 = vmatmul.mubr.bf16.gmra.mrb[8].mxu0 %v2428_v2  ;;  %2240 = vmatprep.mubr.bf16.mxu1 %v2437_v3 }
 0x129   : > { %1978 = vmatprep.mubr.bf16.mxu0 %v2437_v3 }
 0x12f   : > { %2241 = vmatmul.mubr.bf16.gmra.mrb[76].mxu1 %v2436_v42 }
 0x130   : > { %1979 = vmatmul.mubr.bf16.gmra.mrb[12].mxu0 %v2436_v42 }
 0x16a   : > { %v3634_v6 = vpop.f32.mrb[0].mxu1 }
 0x16b   : > { %v3636_v7 = vpop.f32.mrb[1].mxu1 }
 0x16c   : > { %v3638_v57 = vpop.f32.mrb[2].mxu1 }
 0x16d   : > { %v3640_v8 = vpop.f32.mrb[3].mxu1 }
 0x172   : > { %v3642_v53 = vpop.f32.mrb[4].mxu1 }
 0x173   : > { %v3644_v9 = vpop.f32.mrb[5].mxu1 }
 0x174   : > { %v3646_v12 = vpop.f32.mrb[6].mxu1 }
 0x175   : > { %v3648_v13 = vpop.f32.mrb[7].mxu1 }
 0x17a   : > { %v3650_v14 = vpop.f32.mrb[8].mxu1 }
 0x17b   : > { %v3652_v15 = vpop.f32.mrb[9].mxu1 }
 0x17c   : > { %v3654_v18 = vpop.f32.mrb[10].mxu1 }
 0x17d   : > { %v3656_v10 = vpop.f32.mrb[11].mxu1 }
 0x182   : > { %v3658_v58 = vpop.f32.mrb[12].mxu1 }
 0x183   : > { %v3660_v19 = vpop.f32.mrb[13].mxu1 }
 0x184   : > { %v3662_v20 = vpop.f32.mrb[14].mxu1 }
 0x185   : > { %v3664_v4 = vpop.f32.mrb[15].mxu1 }
 0x18a   : > { %v2653_v21 = vpop.f32.mrb[16].mxu1 }
 0x18b   : > { %v2654_v17 = vpop.f32.mrb[17].mxu1 }
 0x18c   : > { %v2655_v22 = vadd.f32 %v2654_v17, %v2653_v21  ;;  %v2656_v24 = vpop.f32.mrb[18].mxu1 }
 0x18d   : > { %v2657_v25 = vpop.f32.mrb[19].mxu1 }
 0x18e   : > { %v2658_v5 = vadd.f32 %v2657_v25, %v2656_v24  ;;  %v2024_v50 = vadd.f32 %v2655_v22, %v509_v55 }
 0x190   : > { %v2027_v56 = vadd.f32 %v2658_v5, %v509_v55 }
 0x192   : > { %v2659_v26 = vpop.f32.mrb[20].mxu1 }
 0x193   : > { %v2660_v27 = vpop.f32.mrb[21].mxu1 }
 0x194   : > { %v2661_v23 = vadd.f32 %v2660_v27, %v2659_v26  ;;  %v2662_v28 = vpop.f32.mrb[22].mxu1 }
 0x195   : > { %v2663_v16 = vpop.f32.mrb[23].mxu1 }
 0x196   : > { %v2664_v30 = vadd.f32 %v2663_v16, %v2662_v28  ;;  %v2032_v62 = vadd.f32 %v2661_v23, %v509_v55 }
 0x198   : > { %v2035_v2 = vadd.f32 %v2664_v30, %v509_v55 }
 0x19a   : > { %v2665_v31 = vpop.f32.mrb[24].mxu1 }
 0x19b   : > { %v2666_v29 = vpop.f32.mrb[25].mxu1 }
 0x19c   : > { %v2667_v32 = vadd.f32 %v2666_v29, %v2665_v31  ;;  %v2668_v33 = vpop.f32.mrb[26].mxu1 }
 0x19d   : > { %v2669_v34 = vpop.f32.mrb[27].mxu1 }
 0x19e   : > { %v2670_v36 = vadd.f32 %v2669_v34, %v2668_v33  ;;  %v2040_v22 = vadd.f32 %v2667_v32, %v509_v55 }
 0x1a0   : > { %v2043_v5 = vadd.f32 %v2670_v36, %v509_v55 }
 0x1a2   : > { %v2671_v38 = vpop.f32.mrb[28].mxu1 }
 0x1a3   : > { %v2672_v39 = vpop.f32.mrb[29].mxu1 }
 0x1a4   : > { %v2673_v43 = vadd.f32 %v2672_v39, %v2671_v38  ;;  %v2674_v44 = vpop.f32.mrb[30].mxu1 }
 0x1a5   : > { %v2675_v45 = vpop.f32.mrb[31].mxu1 }
 0x1a6   : > { %v2676_v46 = vadd.f32 %v2675_v45, %v2674_v44  ;;  %v2048_v23 = vadd.f32 %v2673_v43, %v509_v55 }
 0x1a8   : > { %v2051_v30 = vadd.f32 %v2676_v46, %v509_v55 }
 0x1aa   : > { %v2693_v48 = vpop.f32.mrb[32].mxu1 }
 0x1ab   : > { %v2694_v49 = vpop.f32.mrb[33].mxu1 }
 0x1ac   : > { %v2695_v51 = vadd.f32 %v2694_v49, %v2693_v48  ;;  %v2696_v52 = vpop.f32.mrb[34].mxu1 }
 0x1ad   : > { %v2697_v54 = vpop.f32.mrb[35].mxu1 }
 0x1ae   : > { %v2089_v11 = vadd.f32 %v2695_v51, %v2024_v50  ;;  %v2698_v59 = vadd.f32 %v2697_v54, %v2696_v52 }
 0x1b0   : > { %v2092_v41 = vadd.f32 %v2698_v59, %v2027_v56 }
 0x1b2   : > { %v2699_v60 = vpop.f32.mrb[36].mxu1 }
 0x1b3   : > { %v2700_v61 = vpop.f32.mrb[37].mxu1 }
 0x1b4   : > { %v2701_v63 = vadd.f32 %v2700_v61, %v2699_v60  ;;  %v2702_v0 = vpop.f32.mrb[38].mxu1 }
 0x1b5   : > { %v2703_v1 = vpop.f32.mrb[39].mxu1 }
 0x1b6   : > { %v2097_v3 = vadd.f32 %v2701_v63, %v2032_v62  ;;  %v2704_v42 = vadd.f32 %v2703_v1, %v2702_v0 }
 0x1b8   : > { %v2100_v21 = vadd.f32 %v2704_v42, %v2035_v2 }
 0x1ba   : > { %v2705_v17 = vpop.f32.mrb[40].mxu1 }
 0x1bb   : > { %v2706_v24 = vpop.f32.mrb[41].mxu1 }
 0x1bc   : > { %v2707_v25 = vadd.f32 %v2706_v24, %v2705_v17  ;;  %v2708_v26 = vpop.f32.mrb[42].mxu1  ;;  %v500_v17 = vsub.s32 0, %v3666_v37  ;;  %v504_v24 = vsub.s32 1, %v3666_v37 }
 0x1bd   : > { %v2709_v27 = vpop.f32.mrb[43].mxu1 }
 0x1be   : > { %v2105_v28 = vadd.f32 %v2707_v25, %v2040_v22  ;;  %v2710_v16 = vadd.f32 %v2709_v27, %v2708_v26  ;;  %v3686_v26 = vrot.slane %v3672_v47, %v500_v17 }
 0x1c0   : > { %v2108_v31 = vadd.f32 %v2710_v16, %v2043_v5  ;;  %v3689_v5 = vrot.slane %v3672_v47, %v504_v24  ;;  %v1732_v37 = vadd.f32 %v3634_v6, %v3686_v26 }
 0x1c2   : > { %v2711_v29 = vpop.f32.mrb[44].mxu1 }
 0x1c3   : > { %v2712_v33 = vpop.f32.mrb[45].mxu1 }
 0x1c4   : > { %v2713_v34 = vadd.f32 %v2712_v33, %v2711_v29  ;;  %v2714_v35 = vpop.f32.mrb[46].mxu1  ;;  %v1734_v29 = vadd.f32 %v3636_v7, %v3689_v5 }
 0x1c5   : > { %v2715_v38 = vpop.f32.mrb[47].mxu1 }
 0x1c6   : > { %v2113_v39 = vadd.f32 %v2713_v34, %v2048_v23  ;;  %v2716_v40 = vadd.f32 %v2715_v38, %v2714_v35  ;;  %v1736_v34 = vadd.f32 %v3638_v57, %v3686_v26 }
 0x1c8   : > { %v2116_v44 = vadd.f32 %v2716_v40, %v2051_v30  ;;  %v1738_v30 = vadd.f32 %v3640_v8, %v3689_v5 }
 0x1ca   : > { %v2733_v45 = vpop.f32.mrb[48].mxu1 }
 0x1cb   : > { %v2734_v48 = vpop.f32.mrb[49].mxu1 }
 0x1cc   : > { %v2735_v32 = vadd.f32 %v2734_v48, %v2733_v45  ;;  %v2736_v49 = vpop.f32.mrb[50].mxu1 }
 0x1cd   : > { %v2737_v50 = vpop.f32.mrb[51].mxu1 }
 0x1ce   : > { %v2154_v51 = vadd.f32 %v2735_v32, %v2089_v11  ;;  %v2738_v36 = vadd.f32 %v2737_v50, %v2736_v49 }
 0x1d0   : > { %v2157_v52 = vadd.f32 %v2738_v36, %v2092_v41 }
 0x1d2   : > { %v2739_v54 = vpop.f32.mrb[52].mxu1 }
 0x1d3   : > { %v2740_v56 = vpop.f32.mrb[53].mxu1 }
 0x1d4   : > { %v2741_v59 = vadd.f32 %v2740_v56, %v2739_v54  ;;  %v2742_v60 = vpop.f32.mrb[54].mxu1 }
 0x1d5   : > { %v2743_v43 = vpop.f32.mrb[55].mxu1 }
 0x1d6   : > { %v3675_v61 = vadd.f32 %v2741_v59, %v2097_v3  ;;  %v2744_v62 = vadd.f32 %v2743_v43, %v2742_v60  ;;  %v1742_v60 = vadd.f32 %v3642_v53, %v3686_v26 }
 0x1d8   : > { %v3677_v46 = vadd.f32 %v2744_v62, %v2100_v21 }
 0x1da   : > { %v2745_v55 = vpop.f32.mrb[56].mxu1 }
 0x1db   : > { %v2746_v63 = vpop.f32.mrb[57].mxu1 }
 0x1dc   : > { %v2747_v0 = vadd.f32 %v2746_v63, %v2745_v55  ;;  %v2748_v1 = vpop.f32.mrb[58].mxu1  ;;  %v1746_v63 = vadd.f32 %v3646_v12, %v3686_v26 }
 0x1dd   : > { %v2749_v2 = vpop.f32.mrb[59].mxu1 }
 0x1de   : > { %v3679_v42 = vadd.f32 %v2747_v0, %v2105_v28  ;;  %v2750_v11 = vadd.f32 %v2749_v2, %v2748_v1 }
 0x1e0   : > { %v3681_v41 = vadd.f32 %v2750_v11, %v2108_v31 }
 0x1e2   : > { %v2751_v3 = vpop.f32.mrb[60].mxu1 }
 0x1e3   : > { %v2752_v22 = vpop.f32.mrb[61].mxu1 }
 0x1e4   : > { %v2753_v25 = vadd.f32 %v2752_v22, %v2751_v3  ;;  %v2754_v21 = vpop.f32.mrb[62].mxu1 }
 0x1e5   : > { %v2755_v27 = vpop.f32.mrb[63].mxu1 }
 0x1e6   : > { %v3691_v28 = vadd.f32 %v2753_v25, %v2113_v39  ;;  %v2756_v16 = vadd.f32 %v2755_v27, %v2754_v21 }
 0x1e8   : > { %v3693_v31 = vadd.f32 %v2756_v16, %v2116_v44 }
 0x1ea   : > { %v2773_v23 = vpop.f32.mrb[64].mxu1 }
 0x1eb   : > { %v1950_v33 = vpop.f32.mrb[0].mxu0  ;;  %v2774_v38 = vpop.f32.mrb[65].mxu1 }
 0x1ec   : > { %v2798_v35 = vadd.f32 %v1950_v33, %v1732_v37  ;;  %v1952_v47 = vpop.f32.mrb[1].mxu0  ;;  %v2775_v40 = vadd.f32 %v2774_v38, %v2773_v23  ;;  %v2776_v45 = vpop.f32.mrb[66].mxu1  ;;  %v1752_v23 = vadd.f32 %v3650_v14, %v3686_v26  ;;  %v1756_v38 = vadd.f32 %v3654_v18, %v3686_v26 }
 0x1ed   : > { %v2800_v39 = vadd.f32 %v1952_v47, %v1734_v29  ;;  %v1954_v44 = vpop.f32.mrb[2].mxu0  ;;  %v2777_v49 = vpop.f32.mrb[67].mxu1 }
 0x1ee   : > { %v2249_v48 = vmax.f32 %v2798_v35, 0.0  ;;  %v2802_v6 = vadd.f32 %v1954_v44, %v1736_v34  ;;  %v1956_v32 = vpop.f32.mrb[3].mxu0  ;;  %v2219_v50 = vadd.f32 %v2775_v40, %v2154_v51  ;;  %v2778_v54 = vadd.f32 %v2777_v49, %v2776_v45 }
 0x1ef   : > { %v2250_v7 = vmax.f32 %v2800_v39, 0.0  ;;  %v2804_v36 = vadd.f32 %v1956_v32, %v1738_v30  ;;  %v1744_v51 = vadd.f32 %v3644_v9, %v3689_v5  ;;  %v1754_v34 = vadd.f32 %v3652_v15, %v3689_v5 }
 0x1f0   : > { %2273 = vst [vmem:[%s3704_s25] sm:$0xff] %v2249_v48  ;;  %v2252_v57 = vmax.f32 %v2802_v6, 0.0  ;;  %v2251_v8 = vmax.f32 %v2219_v50, 0.0  ;;  %v2222_v59 = vadd.f32 %v2778_v54, %v2157_v52  ;;  %v1748_v52 = vadd.f32 %v3648_v13, %v3689_v5 }
 0x1f1   : > { %2274 = vst [vmem:[%s3704_s25 + $0x8] sm:$0xff] %v2250_v7  ;;  %v2253_v56 = vmax.f32 %v2804_v36, 0.0 }
 0x1f2   : > { %2276 = vst [vmem:[%s3704_s25 + $0x18] sm:$0xff] %v2252_v57  ;;  %2275 = vst [vmem:[%s3704_s25 + $0x10] sm:$0xff] %v2251_v8  ;;  %v2254_v43 = vmax.f32 %v2222_v59, 0.0  ;;  %v2779_v55 = vpop.f32.mrb[68].mxu1  ;;  %v1764_v59 = vadd.f32 %v3660_v19, %v3689_v5 }
 0x1f3   : > { %2277 = vst [vmem:[%s3704_s25 + $0x20] sm:$0xff] %v2253_v56  ;;  %v1960_v62 = vpop.f32.mrb[4].mxu0  ;;  %v2780_v2 = vpop.f32.mrb[69].mxu1  ;;  %v1762_v56 = vadd.f32 %v3658_v58, %v3686_v26  ;;  %v1768_v58 = vadd.f32 %v3664_v4, %v3689_v5 }
 0x1f4   : > { %v2806_v0 = vadd.f32 %v1960_v62, %v1742_v60  ;;  %v1962_v1 = vpop.f32.mrb[5].mxu0  ;;  %2278 = vst [vmem:[%s3704_s25 + $0x28] sm:$0xff] %v2254_v43  ;;  %v2781_v11 = vadd.f32 %v2780_v2, %v2779_v55  ;;  %v2782_v17 = vpop.f32.mrb[70].mxu1  ;;  %v1766_v43 = vadd.f32 %v3662_v20, %v3686_v26 }
 0x1f5   : > { %v2808_v53 = vadd.f32 %v1962_v1, %v1744_v51  ;;  %v1964_v9 = vpop.f32.mrb[6].mxu0  ;;  %v2783_v12 = vpop.f32.mrb[71].mxu1 }
 0x1f6   : > { %v2255_v24 = vmax.f32 %v2806_v0, 0.0  ;;  %v2810_v3 = vadd.f32 %v1964_v9, %v1746_v63  ;;  %v1966_v22 = vpop.f32.mrb[7].mxu0  ;;  %v2227_v21 = vadd.f32 %v2781_v11, %v3675_v61  ;;  %v2784_v16 = vadd.f32 %v2783_v12, %v2782_v17 }
 0x1f7   : > { %v2256_v25 = vmax.f32 %v2808_v53, 0.0  ;;  %v2812_v27 = vadd.f32 %v1966_v22, %v1748_v52 }
 0x1f8   : > { %2279 = vst [vmem:[%s3704_s25 + $0x30] sm:$0xff] %v2255_v24  ;;  %v2258_v13 = vmax.f32 %v2810_v3, 0.0  ;;  %v2257_v37 = vmax.f32 %v2227_v21, 0.0  ;;  %v2230_v33 = vadd.f32 %v2784_v16, %v3677_v46  ;;  %v1758_v46 = vadd.f32 %v3656_v10, %v3689_v5 }
 0x1f9   : > { %2280 = vst [vmem:[%s3704_s25 + $0x38] sm:$0xff] %v2256_v25  ;;  %v2259_v29 = vmax.f32 %v2812_v27, 0.0 }
 0x1fa   : > { %2282 = vst [vmem:[%s3704_s25 + $0x48] sm:$0xff] %v2258_v13  ;;  %2281 = vst [vmem:[%s3704_s25 + $0x40] sm:$0xff] %v2257_v37  ;;  %v2260_v61 = vmax.f32 %v2230_v33, 0.0  ;;  %v2785_v47 = vpop.f32.mrb[72].mxu1 }
 0x1fb   : > { %2283 = vst [vmem:[%s3704_s25 + $0x50] sm:$0xff] %v2259_v29  ;;  %v1970_v35 = vpop.f32.mrb[8].mxu0  ;;  %v2786_v40 = vpop.f32.mrb[73].mxu1 }
 0x1fc   : > { %v2814_v30 = vadd.f32 %v1970_v35, %v1752_v23  ;;  %v1972_v39 = vpop.f32.mrb[9].mxu0  ;;  %2284 = vst [vmem:[%s3704_s25 + $0x58] sm:$0xff] %v2260_v61  ;;  %v2787_v44 = vadd.f32 %v2786_v40, %v2785_v47  ;;  %v2788_v45 = vpop.f32.mrb[74].mxu1 }
 0x1fd   : > { %v2816_v14 = vadd.f32 %v1972_v39, %v1754_v34  ;;  %v1974_v15 = vpop.f32.mrb[10].mxu0  ;;  %v2789_v18 = vpop.f32.mrb[75].mxu1 }
 0x1fe   : > { %v2261_v48 = vmax.f32 %v2814_v30, 0.0  ;;  %v2818_v6 = vadd.f32 %v1974_v15, %v1756_v38  ;;  %v1976_v32 = vpop.f32.mrb[11].mxu0  ;;  %v2235_v7 = vadd.f32 %v2787_v44, %v3679_v42  ;;  %v2790_v36 = vadd.f32 %v2789_v18, %v2788_v45 }
 0x1ff   : > { %v2262_v49 = vmax.f32 %v2816_v14, 0.0  ;;  %v2820_v50 = vadd.f32 %v1976_v32, %v1758_v46 }
 0x200   : > { %2285 = vst [vmem:[%s3704_s25 + $0x60] sm:$0xff] %v2261_v48  ;;  %v2264_v10 = vmax.f32 %v2818_v6, 0.0  ;;  %v2263_v54 = vmax.f32 %v2235_v7, 0.0  ;;  %v2238_v8 = vadd.f32 %v2790_v36, %v3681_v41 }
 0x201   : > { %2286 = vst [vmem:[%s3704_s25 + $0x68] sm:$0xff] %v2262_v49  ;;  %v2265_v57 = vmax.f32 %v2820_v50, 0.0 }
 0x202   : > { %2288 = vst [vmem:[%s3704_s25 + $0x78] sm:$0xff] %v2264_v10  ;;  %2287 = vst [vmem:[%s3704_s25 + $0x70] sm:$0xff] %v2263_v54  ;;  %v2266_v42 = vmax.f32 %v2238_v8, 0.0  ;;  %v2791_v51 = vpop.f32.mrb[76].mxu1 }
 0x203   : > { %2289 = vst [vmem:[%s3704_s25 + $0x80] sm:$0xff] %v2265_v57  ;;  %v1980_v60 = vpop.f32.mrb[12].mxu0  ;;  %v2792_v63 = vpop.f32.mrb[77].mxu1 }
 0x204   : > { %v2822_v62 = vadd.f32 %v1980_v60, %v1762_v56  ;;  %v1982_v55 = vpop.f32.mrb[13].mxu0  ;;  %2290 = vst [vmem:[%s3704_s25 + $0x88] sm:$0xff] %v2266_v42  ;;  %v2793_v19 = vadd.f32 %v2792_v63, %v2791_v51  ;;  %v2794_v1 = vpop.f32.mrb[78].mxu1 }
 0x205   : > { %v2824_v41 = vadd.f32 %v1982_v55, %v1764_v59  ;;  %v1984_v0 = vpop.f32.mrb[14].mxu0  ;;  %v2795_v11 = vpop.f32.mrb[79].mxu1 }
 0x206   : > { %v2267_v2 = vmax.f32 %v2822_v62, 0.0  ;;  %v2826_v52 = vadd.f32 %v1984_v0, %v1766_v43  ;;  %v1986_v53 = vpop.f32.mrb[15].mxu0  ;;  %v2243_v26 = vadd.f32 %v2793_v19, %v3691_v28  ;;  %v2796_v5 = vadd.f32 %v2795_v11, %v2794_v1 }
 0x207   : > { %v2268_v20 = vmax.f32 %v2824_v41, 0.0  ;;  %v2828_v4 = vadd.f32 %v1986_v53, %v1768_v58 }
 0x208   : > { %2291 = vst [vmem:[%s3704_s25 + $0x90] sm:$0xff] %v2267_v2  ;;  %v2270_v9 = vmax.f32 %v2826_v52, 0.0  ;;  %v2269_v17 = vmax.f32 %v2243_v26, 0.0  ;;  %v2246_v3 = vadd.f32 %v2796_v5, %v3693_v31 }
 0x209   : > { %2292 = vst [vmem:[%s3704_s25 + $0x98] sm:$0xff] %v2268_v20  ;;  %v2271_v24 = vmax.f32 %v2828_v4, 0.0 }
 0x20a   : > { %2294 = vst [vmem:[%s3704_s25 + $0xa8] sm:$0xff] %v2270_v9  ;;  %2293 = vst [vmem:[%s3704_s25 + $0xa0] sm:$0xff] %v2269_v17  ;;  %v2272_v28 = vmax.f32 %v2246_v3, 0.0 }
 0x20b   : > { %2295 = vst [vmem:[%s3704_s25 + $0xb0] sm:$0xff] %v2271_v24 }
 0x20c   : > { %2296 = vst [vmem:[%s3704_s25 + $0xb8] sm:$0xff] %v2272_v28 }
 0x20d   : > { %3253 = shalt.err (!%p3250_p7)
}
 0x20e   : > { %s3254_s22 = scalar_lea.hbm %s3762_s11, 3072  ;;  %s3258_s9 = scalar_lea.hbm %s3814_s3, 6144 }
 0x20f   : > { %p3255_p9 = scmp.ne.s32.totalorder %s3762_s11, %s3254_s22  ;;  %p3259_p5 = scmp.lt.u32.totalorder %s3762_s11, %s3814_s3 }
 0x210   : > { %p3260_p11 = scmp.lt.u32.totalorder %s3258_s9, %s3254_s22  ;;  %p3262_p4 = scmp.lt.u32.totalorder %s3254_s22, %s3762_s11 }
 0x211   : > { %p3256_p2 = pnand %p3255_p9, %p3432_p12 }
 0x212   : > { %p3261_p1 = por %p3260_p11, %p3259_p5 }
 0x213   : > { %p3257_p0 = pneg %p3256_p2 }
 0x214   : > { %p3263_p6 = por %p3262_p4, %p3261_p1 }
 0x216   : > { %p3264_p8 = pnand %p3263_p6, %p3257_p0 }
 0x218   : > { %3267 = shalt.err (!%p3264_p8)
}
 0x219   : > { %s3319_s4 = smov 384   ;;  %s3320_s25 = smov 24  }
 0x21a   : > { %2869 = dma.vmem_to_hbm [thread:$0]  (%p3432_p12), %s3764_s5, 3072, %s3762_s11, %s2298_s27, %s3319_s4, %s3319_s4, %s3320_s25  }
 0x21b PF: > { %s2327_s26 = sand.u32 1, %s3298_s12   ;;  %p3829_p10 = scmp.ne.s32.totalorder %s3819_s19, 0 }
 0x21c   : > { %p3830_p13 = scmp.ge.s32.totalorder %s3310_s15, 2  ;;  %s2328_s10 = scalar_lea.sflag [#allocation4], %s2327_s26 }
 0x21e   : > { %p2880_p3 = pnand %p3830_p13, %p3829_p10 }
 0x220   : > { %3293 = dma.done.wait (!%p2880_p3), %s2328_s10, 3072  }
 0x221   : > { %3295 = vsyncadd (!%p2880_p3), %s2328_s10, 4294964224  ;;  %p17_p7 = scmp.ge.s32.totalorder %s3397_s24, 4   ;;  %s3831_s12 = smov %s3302_s13 }
 0x222   : > { %s3832_s13 = smov %s3306_s14  ;;  %s3833_s14 = smov %s3428_s17 }
 0x223   : > { %s3834_s15 = smov %s3397_s24  ;;  %19 = sbr.rel (!%p17_p7) target bundleno = 6 (0x6), region = 81 }
 0x22a   :  { %2333 = vsyncpa [#allocation3], 1 }
 0x22b   :  { %2335 = vsyncpa [#allocation3 + $0x1], 1 }
 0x22c   :  { %2336 = vsyncpa [#allocation6], 1 }
 0x22d   :  { %2337 = vsyncpa [#allocation4], 1 }
 0x22e   :  { %2339 = vsyncpa [#allocation4 + $0x1], 1 }

</bundles_post_ra>
